<compile_context>
chip_gen: v7x
topology: tpu7x:2x2x1
jax: 0.10.0
libtpu: 0.0.40
codegen_flags: <defaults>
</compile_context>

<pallas_src>
import functools

import jax
import jax.numpy as jnp
from jax.experimental import pallas as pl
from jax.experimental.pallas import tpu as pltpu

F32 = jnp.float32
BF16 = jnp.bfloat16


def _round_up(x, m):
    return ((x + m - 1) // m) * m


def _pad_axis(a, target, axis):
    pad = target - a.shape[axis]
    if pad == 0:
        return a
    widths = [(0, 0)] * a.ndim
    widths[axis] = (0, pad)
    return jnp.pad(a, widths)


def _full(arr):
    """Whole-array BlockSpec for a 1-D grid (weights / biases)."""
    n = arr.ndim
    return pl.BlockSpec(arr.shape, lambda i, _n=n: (0,) * _n)


# --------------------------------------------------------------------------------------
# Shared TPP block (runs on VMEM tiles inside kernels)
# --------------------------------------------------------------------------------------
def _tpp_block(S, V, Fr, w_vdown, w_s_all, b_s, w_vup, w_gate, b_gate, *, use_act):
    """One TPP (GCP-style) block on a tile.

    S : (TM, ds_in)   V : (3, TM, dv_in)   Fr : (3, TM, 3)
    w_s_all = [w_ss ; w_sn ; w_sf0 ; w_sf1 ; w_sf2]  -> (ds_in + 4*dv_h, ds_out)
    returns (TM, ds_out), (3, TM, dv_out)
    """
    _, tm, dv_in = V.shape
    dv_h = w_vdown.shape[1]

    # vector down-projection: one fused MXU matmul over all 3 xyz components
    vd_flat = jnp.dot(V.reshape(3 * tm, dv_in), w_vdown, preferred_element_type=F32)
    vd = vd_flat.reshape(3, tm, dv_h)

    # invariant features: channel norms + frame scalarization
    norms = jnp.sqrt(vd[0] * vd[0] + vd[1] * vd[1] + vd[2] * vd[2] + 1e-8)
    sc = [vd[0] * Fr[0, :, k:k + 1]
          + vd[1] * Fr[1, :, k:k + 1]
          + vd[2] * Fr[2, :, k:k + 1] for k in range(3)]

    feats = jnp.concatenate([S, norms, sc[0], sc[1], sc[2]], axis=-1)
    s_pre = jnp.dot(feats, w_s_all, preferred_element_type=F32) + b_s
    s_out = jax.nn.silu(s_pre) if use_act else s_pre

    # gated vector up-projection (again one fused matmul over the 3 components)
    gate = jax.nn.sigmoid(
        jnp.dot(s_out, w_gate, preferred_element_type=F32) + b_gate)
    vu = jnp.dot(vd_flat, w_vup, preferred_element_type=F32)
    v_out = vu.reshape(3, tm, w_vup.shape[1]) * gate[None]
    return s_out, v_out


# --------------------------------------------------------------------------------------
# Kernels
# --------------------------------------------------------------------------------------
def msg_kernel(s_ref, v_ref, fr_ref,
               w_vd_ref, w_s_ref, b_s_ref, w_vu_ref, w_g_ref, b_g_ref,
               w_att_ref, b_att_ref, out_ref, *, s0, v0):
    """Message TPP + scalar-message attention; emits lane-dense combined messages.

    out layout per row: [ att*msg_s (s0) | msg_vx (v0) | msg_vy (v0) | msg_vz (v0) ]
    """
    s_out, v_out = _tpp_block(
        s_ref[...], v_ref[...], fr_ref[...],
        w_vd_ref[...], w_s_ref[...], b_s_ref[...],
        w_vu_ref[...], w_g_ref[...], b_g_ref[...], use_act=True)
    att = jax.nn.sigmoid(
        jnp.dot(s_out, w_att_ref[...], preferred_element_type=F32) + b_att_ref[...])
    out_ref[...] = jnp.concatenate(
        [att * s_out, v_out[0], v_out[1], v_out[2]], axis=-1)


def aggregate_kernel(dst_ref, msg_ref, out_ref, acc_ref):
    """Sum-aggregation of combined messages into destination nodes.

    Adjacency tile is generated on-chip (iota == dst), never stored in HBM.
    grid = (node tiles [parallel], edge tiles [arbitrary/reduction]).
    """
    ni = pl.program_id(0)
    ei = pl.program_id(1)

    @pl.when(ei == 0)
    def _():
        acc_ref[...] = jnp.zeros_like(acc_ref)

    tn = acc_ref.shape[0]
    dst = dst_ref[...]                                   # (1, TE) int32
    te = dst.shape[1]
    row_ids = jax.lax.broadcasted_iota(jnp.int32, (tn, te), 0) + ni * tn
    adj = (row_ids == dst).astype(BF16)                  # (TN, TE) 0/1
    msg = msg_ref[...].astype(BF16)                      # (TE, C)
    acc_ref[...] += jnp.dot(adj, msg, preferred_element_type=F32)

    @pl.when(ei == pl.num_programs(1) - 1)
    def _():
        out_ref[...] = acc_ref[...]


def ff_norm_kernel(agg_ref, ns_ref, nv_ref, fr_ref,
                   w_vd1, w_s1, b_s1, w_vu1, w_g1, b_g1,
                   w_vd2, w_s2, b_s2, w_vu2, w_g2, b_g2,
                   gamma_ref, beta_ref,
                   s_out_ref, v_out_ref, *, s0, v0):
    """Fused: concat(residual, node) -> TPP ff1 -> TPP ff2 -> +node residual -> TPPNorm."""
    agg = agg_ref[...]                                   # (TN, s0 + 3*v0)
    agg_s = agg[:, :s0]
    agg_v = jnp.stack([agg[:, s0 + k * v0: s0 + (k + 1) * v0] for k in range(3)], axis=0)

    ns = ns_ref[...]
    nv = nv_ref[...]
    fr = fr_ref[...]

    hid_s = jnp.concatenate([agg_s, ns], axis=-1)        # (TN, 2*s0)
    hid_v = jnp.concatenate([agg_v, nv], axis=-1)        # (3, TN, 2*v0)

    hid_s, hid_v = _tpp_block(hid_s, hid_v, fr,
                              w_vd1[...], w_s1[...], b_s1[...],
                              w_vu1[...], w_g1[...], b_g1[...], use_act=True)
    hid_s, hid_v = _tpp_block(hid_s, hid_v, fr,
                              w_vd2[...], w_s2[...], b_s2[...],
                              w_vu2[...], w_g2[...], b_g2[...], use_act=False)

    s_res = ns + hid_s
    v_res = nv + hid_v

    # TPPNorm on rank 0: scalar LayerNorm + vector RMS-norm over channels
    mean = jnp.mean(s_res, axis=-1, keepdims=True)
    cent = s_res - mean
    var = jnp.mean(cent * cent, axis=-1, keepdims=True)
    s_out_ref[...] = cent * jax.lax.rsqrt(var + 1e-5) * gamma_ref[...] + beta_ref[...]

    sq = jnp.maximum(v_res[0] * v_res[0] + v_res[1] * v_res[1] + v_res[2] * v_res[2], 1e-8)
    inv = jax.lax.rsqrt(jnp.mean(sq, axis=-1, keepdims=True))
    v_out_ref[...] = v_res * inv[None]


# --------------------------------------------------------------------------------------
# pallas_call wrappers
# --------------------------------------------------------------------------------------
def run_msg(p, att, S, Vx, Fx, *, s0, v0, tile):
    E_pad, ds_in = S.shape
    dv_in = Vx.shape[2]
    C = s0 + 3 * v0
    kernel = functools.partial(msg_kernel, s0=s0, v0=v0)
    return pl.pallas_call(
        kernel,
        grid=(E_pad // tile,),
        out_shape=jax.ShapeDtypeStruct((E_pad, C), F32),
        in_specs=[
            pl.BlockSpec((tile, ds_in), lambda i: (i, 0)),
            pl.BlockSpec((3, tile, dv_in), lambda i: (0, i, 0)),
            pl.BlockSpec((3, tile, 3), lambda i: (0, i, 0)),
            _full(p["w_vdown"]), _full(p["w_s_all"]), _full(p["b_s"]),
            _full(p["w_vup"]), _full(p["w_gate"]), _full(p["b_gate"]),
            _full(att["w_att"]), _full(att["b_att"]),
        ],
        out_specs=pl.BlockSpec((tile, C), lambda i: (i, 0)),
        compiler_params=pltpu.CompilerParams(dimension_semantics=("parallel",)),
    )(S, Vx, Fx, p["w_vdown"], p["w_s_all"], p["b_s"], p["w_vup"], p["w_gate"],
      p["b_gate"], att["w_att"], att["b_att"])


def run_aggregate(dst_pad, msg_comb, *, n_pad, tn, te):
    E_pad, C = msg_comb.shape
    return pl.pallas_call(
        aggregate_kernel,
        grid=(n_pad // tn, E_pad // te),
        out_shape=jax.ShapeDtypeStruct((n_pad, C), F32),
        in_specs=[
            pl.BlockSpec((1, te), lambda ni, ei: (0, ei)),
            pl.BlockSpec((te, C), lambda ni, ei: (ei, 0)),
        ],
        out_specs=pl.BlockSpec((tn, C), lambda ni, ei: (ni, 0)),
        scratch_shapes=[pltpu.VMEM((tn, C), F32)],
        compiler_params=pltpu.CompilerParams(
            dimension_semantics=("parallel", "arbitrary")),
    )(dst_pad, msg_comb)


def run_ff_norm(params, agg_comb, node_s, node_vx, node_fx, *, s0, v0, tile):
    N_pad = node_s.shape[0]
    C = agg_comb.shape[1]
    p1, p2, nrm = params["ff1"], params["ff2"], params["norm"]
    kernel = functools.partial(ff_norm_kernel, s0=s0, v0=v0)
    return pl.pallas_call(
        kernel,
        grid=(N_pad // tile,),
        out_shape=(jax.ShapeDtypeStruct((N_pad, s0), F32),
                   jax.ShapeDtypeStruct((3, N_pad, v0), F32)),
        in_specs=[
            pl.BlockSpec((tile, C), lambda i: (i, 0)),
            pl.BlockSpec((tile, s0), lambda i: (i, 0)),
            pl.BlockSpec((3, tile, v0), lambda i: (0, i, 0)),
            pl.BlockSpec((3, tile, 3), lambda i: (0, i, 0)),
            _full(p1["w_vdown"]), _full(p1["w_s_all"]), _full(p1["b_s"]),
            _full(p1["w_vup"]), _full(p1["w_gate"]), _full(p1["b_gate"]),
            _full(p2["w_vdown"]), _full(p2["w_s_all"]), _full(p2["b_s"]),
            _full(p2["w_vup"]), _full(p2["w_gate"]), _full(p2["b_gate"]),
            _full(nrm["gamma"]), _full(nrm["beta"]),
        ],
        out_specs=(pl.BlockSpec((tile, s0), lambda i: (i, 0)),
                   pl.BlockSpec((3, tile, v0), lambda i: (0, i, 0))),
        compiler_params=pltpu.CompilerParams(dimension_semantics=("parallel",)),
    )(agg_comb, node_s, node_vx, node_fx,
      p1["w_vdown"], p1["w_s_all"], p1["b_s"], p1["w_vup"], p1["w_gate"], p1["b_gate"],
      p2["w_vdown"], p2["w_s_all"], p2["b_s"], p2["w_vup"], p2["w_gate"], p2["b_gate"],
      nrm["gamma"], nrm["beta"])


# --------------------------------------------------------------------------------------
# Parameter init (deterministic, synthetic)
# --------------------------------------------------------------------------------------
def _linear(key, fan_in, fan_out):
    return jax.random.normal(key, (fan_in, fan_out), F32) / jnp.sqrt(float(fan_in))


def make_tpp_params(key, ds_in, dv_in, ds_out, dv_out):
    dv_h = max(dv_in, dv_out)
    ks = jax.random.split(key, 8)
    # scalar-path weights pre-stacked into a single (ds_in + 4*dv_h, ds_out) matrix
    w_s_all = jnp.concatenate([
        _linear(ks[1], ds_in, ds_out),   # on input scalars
        _linear(ks[2], dv_h, ds_out),    # on vector channel norms
        _linear(ks[3], dv_h, ds_out),    # on frame scalarization k=0
        _linear(ks[4], dv_h, ds_out),    # k=1
        _linear(ks[5], dv_h, ds_out),    # k=2
    ], axis=0)
    return dict(
        w_vdown=_linear(ks[0], dv_in, dv_h),
        w_s_all=w_s_all,
        b_s=jnp.zeros((1, ds_out), F32),
        w_vup=_linear(ks[6], dv_h, dv_out),
        w_gate=_linear(ks[7], ds_out, dv_out),
        b_gate=jnp.zeros((1, dv_out), F32),
    )


def make_params(key, s0, v0, s1, v1):
    ks = jax.random.split(key, 4)
    return dict(
        # message TPP: input = concat(node_i, node_j, edge) -> output node dims
        msg=make_tpp_params(ks[0], 2 * s0 + s1, 2 * v0 + v1, s0, v0),
        att=dict(w_att=_linear(ks[1], s0, 1), b_att=jnp.zeros((1, 1), F32)),
        # feedforward_network: TPP(2*s0,2*v0 -> 4*s0,2*v0), TPP(4*s0,2*v0 -> s0,v0)
        ff1=make_tpp_params(ks[2], 2 * s0, 2 * v0, 4 * s0, 2 * v0),
        ff2=make_tpp_params(ks[3], 4 * s0, 2 * v0, s0, v0),
        norm=dict(gamma=jnp.ones((1, s0), F32), beta=jnp.zeros((1, s0), F32)),
    )


# --------------------------------------------------------------------------------------
# TPPInteraction.forward
# --------------------------------------------------------------------------------------
def tpp_interaction_forward(params, X_dict, neighbor_dict, frame_dict, *, tile=256):
    # tile = row tile for all kernels; use 128 on v5e, 256 on v6e/v7x.
    node_s, node_v = X_dict[0]          # (N, s0), (N, v0, 3)
    edge_s, edge_v = X_dict[1]          # (E, s1), (E, v1, 3)
    edge_index = neighbor_dict["edge_index"]
    src, dst = edge_index[0], edge_index[1]
    N, s0 = node_s.shape
    v0 = node_v.shape[1]
    E = edge_s.shape[0]

    to_xyz = lambda v: jnp.transpose(v, (2, 0, 1))     # (M, C, 3) -> (3, M, C)
    from_xyz = lambda v: jnp.transpose(v, (1, 2, 0))   # (3, M, C) -> (M, C, 3)
    node_vx, edge_vx = to_xyz(node_v), to_xyz(edge_v)
    node_fx = jnp.transpose(frame_dict[0], (2, 0, 1))  # (N,3,3)[m,k,x] -> (3,N,3)[x,m,k]
    edge_fx = jnp.transpose(frame_dict[1], (2, 0, 1))

    # tiling / padding (no silent tail drop)
    TE = min(tile, _round_up(E, 8))
    E_pad = _round_up(E, TE)
    TN = min(tile, _round_up(N, 8))
    N_pad = _round_up(N, TN)

    # ---- TPPMessagePassing (sum reduce, scalar message attention) ----
    # TODO(synk): gather + concat of message inputs kept in XLA.
    msg_s_in = jnp.concatenate([node_s[dst], node_s[src], edge_s], axis=-1)
    msg_v_in = jnp.concatenate([node_vx[:, dst], node_vx[:, src], edge_vx], axis=-1)

    msg_s_in = _pad_axis(msg_s_in, E_pad, 0)
    msg_v_in = _pad_axis(msg_v_in, E_pad, 1)
    edge_fx_p = _pad_axis(edge_fx, E_pad, 1)
    dst_pad = jnp.full((1, E_pad), -1, jnp.int32).at[0, :E].set(dst.astype(jnp.int32))

    msg_comb = run_msg(params["msg"], params["att"], msg_s_in, msg_v_in, edge_fx_p,
                       s0=s0, v0=v0, tile=TE)                       # (E_pad, s0+3*v0)
    agg_comb = run_aggregate(dst_pad, msg_comb, n_pad=N_pad, tn=TN, te=TE)

    # ---- hidden_residual concat + feedforward_network + residual + tpp_norm (fused) ----
    node_s_p = _pad_axis(node_s, N_pad, 0)
    node_vx_p = _pad_axis(node_vx, N_pad, 1)
    node_fx_p = _pad_axis(node_fx, N_pad, 1)
    out_s, out_vx = run_ff_norm(params, agg_comb, node_s_p, node_vx_p, node_fx_p,
                                s0=s0, v0=v0, tile=TN)

    out_s = out_s[:N]
    out_vx = out_vx[:, :N]

    new_X = dict(X_dict)
    new_X[0] = (out_s, from_xyz(out_vx))
    return new_X


# --------------------------------------------------------------------------------------
if __name__ == "__main__":
    key = jax.random.PRNGKey(0)
    N, E = 16, 32                 # nodes, edges
    s0, v0 = 32, 4                # rank-0 (node) scalar / vector channel dims
    s1, v1 = 16, 2                # rank-1 (edge) scalar / vector channel dims

    kp, k0, k1, k2, k3, k4, k5 = jax.random.split(key, 7)
    params = make_params(kp, s0, v0, s1, v1)

    node_s = jax.random.normal(k0, (N, s0), F32)
    node_v = jax.random.normal(k1, (N, v0, 3), F32)
    edge_s = jax.random.normal(k2, (E, s1), F32)
    edge_v = jax.random.normal(k3, (E, v1, 3), F32)

    def rand_frames(k, M):
        f = jax.random.normal(k, (M, 3, 3), F32)
        return f / jnp.linalg.norm(f, axis=-1, keepdims=True)

    frame_dict = {0: rand_frames(k4, N), 1: rand_frames(k5, E)}
    edge_index = jnp.stack([jnp.arange(E) % N, (jnp.arange(E) * 5 + 1) % N]).astype(jnp.int32)

    X_dict = {0: (node_s, node_v), 1: (edge_s, edge_v)}
    neighbor_dict = {"edge_index": edge_index}

    out = tpp_interaction_forward(params, X_dict, neighbor_dict, frame_dict)
    jax.block_until_ready(out[0][0])
    jax.block_until_ready(out[0][1])
    assert out[0][0].shape == (N, s0) and out[0][1].shape == (N, v0, 3)
    assert bool(jnp.all(jnp.isfinite(out[0][0]))) and bool(jnp.all(jnp.isfinite(out[0][1])))
    print("KERNEL_OK")
</pallas_src>

<mosaic_0001>
module attributes {stable_mosaic.version = 11 : i64} {
  func.func @msg_kernel(%arg0: i32, %arg1: memref<32x80xf32, #tpu.memory_space<vmem>>, %arg2: memref<3x32x10xf32, #tpu.memory_space<vmem>>, %arg3: memref<3x32x3xf32, #tpu.memory_space<vmem>>, %arg4: memref<10x10xf32, #tpu.memory_space<vmem>>, %arg5: memref<120x32xf32, #tpu.memory_space<vmem>>, %arg6: memref<1x32xf32, #tpu.memory_space<vmem>>, %arg7: memref<10x4xf32, #tpu.memory_space<vmem>>, %arg8: memref<32x4xf32, #tpu.memory_space<vmem>>, %arg9: memref<1x4xf32, #tpu.memory_space<vmem>>, %arg10: memref<32x1xf32, #tpu.memory_space<vmem>>, %arg11: memref<1x1xf32, #tpu.memory_space<vmem>>, %arg12: memref<32x44xf32, #tpu.memory_space<vmem>>) attributes {dimension_semantics = [#tpu.dimension_semantics<parallel>], iteration_bounds = array<i64: 1>, scalar_prefetch = 0 : i64, scratch_operands = 0 : i64, tpu.core_type = #tpu.core_type<tc>, window_params = [{transform_indices = @transform_0, window_bounds = array<i64: 32, 80>}, {transform_indices = @transform_1, window_bounds = array<i64: 3, 32, 10>}, {transform_indices = @transform_2, window_bounds = array<i64: 3, 32, 3>}, {pipeline_mode = #tpu.pipeline_mode<synchronous>, transform_indices = @transform_3, window_bounds = array<i64: 10, 10>}, {pipeline_mode = #tpu.pipeline_mode<synchronous>, transform_indices = @transform_4, window_bounds = array<i64: 120, 32>}, {pipeline_mode = #tpu.pipeline_mode<synchronous>, transform_indices = @transform_5, window_bounds = array<i64: 1, 32>}, {pipeline_mode = #tpu.pipeline_mode<synchronous>, transform_indices = @transform_6, window_bounds = array<i64: 10, 4>}, {pipeline_mode = #tpu.pipeline_mode<synchronous>, transform_indices = @transform_7, window_bounds = array<i64: 32, 4>}, {pipeline_mode = #tpu.pipeline_mode<synchronous>, transform_indices = @transform_8, window_bounds = array<i64: 1, 4>}, {pipeline_mode = #tpu.pipeline_mode<synchronous>, transform_indices = @transform_9, window_bounds = array<i64: 32, 1>}, {pipeline_mode = #tpu.pipeline_mode<synchronous>, transform_indices = @transform_10, window_bounds = array<i64: 1, 1>}, {transform_indices = @transform_11, window_bounds = array<i64: 32, 44>}]} {
    %c0 = arith.constant 0 : index
    %c0_0 = arith.constant 0 : index
    %0 = vector.load %arg1[%c0, %c0_0] : memref<32x80xf32, #tpu.memory_space<vmem>>, vector<32x80xf32>
    %c0_1 = arith.constant 0 : index
    %c0_2 = arith.constant 0 : index
    %c0_3 = arith.constant 0 : index
    %1 = vector.load %arg2[%c0_1, %c0_2, %c0_3] : memref<3x32x10xf32, #tpu.memory_space<vmem>>, vector<3x32x10xf32>
    %c0_4 = arith.constant 0 : index
    %c0_5 = arith.constant 0 : index
    %c0_6 = arith.constant 0 : index
    %2 = vector.load %arg3[%c0_4, %c0_5, %c0_6] : memref<3x32x3xf32, #tpu.memory_space<vmem>>, vector<3x32x3xf32>
    %c0_7 = arith.constant 0 : index
    %c0_8 = arith.constant 0 : index
    %3 = vector.load %arg4[%c0_7, %c0_8] : memref<10x10xf32, #tpu.memory_space<vmem>>, vector<10x10xf32>
    %c0_9 = arith.constant 0 : index
    %c0_10 = arith.constant 0 : index
    %4 = vector.load %arg5[%c0_9, %c0_10] : memref<120x32xf32, #tpu.memory_space<vmem>>, vector<120x32xf32>
    %c0_11 = arith.constant 0 : index
    %c0_12 = arith.constant 0 : index
    %5 = vector.load %arg6[%c0_11, %c0_12] : memref<1x32xf32, #tpu.memory_space<vmem>>, vector<1x32xf32>
    %c0_13 = arith.constant 0 : index
    %c0_14 = arith.constant 0 : index
    %6 = vector.load %arg7[%c0_13, %c0_14] : memref<10x4xf32, #tpu.memory_space<vmem>>, vector<10x4xf32>
    %c0_15 = arith.constant 0 : index
    %c0_16 = arith.constant 0 : index
    %7 = vector.load %arg8[%c0_15, %c0_16] : memref<32x4xf32, #tpu.memory_space<vmem>>, vector<32x4xf32>
    %c0_17 = arith.constant 0 : index
    %c0_18 = arith.constant 0 : index
    %8 = vector.load %arg9[%c0_17, %c0_18] : memref<1x4xf32, #tpu.memory_space<vmem>>, vector<1x4xf32>
    %9 = vector.shape_cast %1 : vector<3x32x10xf32> to vector<96x10xf32>
    %cst = arith.constant dense<0.000000e+00> : vector<96x10xf32>
    %10 = tpu.matmul %9, %3, %cst {dimension_numbers = #tpu.dot_dimension_numbers<[1], [0], [0], [1], [0, 0, 1, 1], [], []>} : vector<96x10xf32>, vector<10x10xf32>, vector<96x10xf32> -> vector<96x10xf32>
    %11 = vector.shape_cast %10 : vector<96x10xf32> to vector<3x32x10xf32>
    %12 = vector.extract_strided_slice %11 {offsets = [0, 0, 0], sizes = [1, 32, 10], strides = [1, 1, 1]} : vector<3x32x10xf32> to vector<1x32x10xf32>
    %13 = vector.shape_cast %12 : vector<1x32x10xf32> to vector<32x10xf32>
    %14 = vector.extract_strided_slice %11 {offsets = [0, 0, 0], sizes = [1, 32, 10], strides = [1, 1, 1]} : vector<3x32x10xf32> to vector<1x32x10xf32>
    %15 = vector.shape_cast %14 : vector<1x32x10xf32> to vector<32x10xf32>
    %16 = arith.mulf %13, %15 : vector<32x10xf32>
    %17 = vector.extract_strided_slice %11 {offsets = [1, 0, 0], sizes = [1, 32, 10], strides = [1, 1, 1]} : vector<3x32x10xf32> to vector<1x32x10xf32>
    %18 = vector.shape_cast %17 : vector<1x32x10xf32> to vector<32x10xf32>
    %19 = vector.extract_strided_slice %11 {offsets = [1, 0, 0], sizes = [1, 32, 10], strides = [1, 1, 1]} : vector<3x32x10xf32> to vector<1x32x10xf32>
    %20 = vector.shape_cast %19 : vector<1x32x10xf32> to vector<32x10xf32>
    %21 = arith.mulf %18, %20 : vector<32x10xf32>
    %22 = arith.addf %16, %21 : vector<32x10xf32>
    %23 = vector.extract_strided_slice %11 {offsets = [2, 0, 0], sizes = [1, 32, 10], strides = [1, 1, 1]} : vector<3x32x10xf32> to vector<1x32x10xf32>
    %24 = vector.shape_cast %23 : vector<1x32x10xf32> to vector<32x10xf32>
    %25 = vector.extract_strided_slice %11 {offsets = [2, 0, 0], sizes = [1, 32, 10], strides = [1, 1, 1]} : vector<3x32x10xf32> to vector<1x32x10xf32>
    %26 = vector.shape_cast %25 : vector<1x32x10xf32> to vector<32x10xf32>
    %27 = arith.mulf %24, %26 : vector<32x10xf32>
    %28 = arith.addf %22, %27 : vector<32x10xf32>
    %cst_19 = arith.constant 9.99999993E-9 : f32
    %29 = vector.broadcast %cst_19 : f32 to vector<32x10xf32>
    %30 = arith.addf %28, %29 : vector<32x10xf32>
    %31 = math.sqrt %30 : vector<32x10xf32>
    %32 = vector.extract_strided_slice %11 {offsets = [0, 0, 0], sizes = [1, 32, 10], strides = [1, 1, 1]} : vector<3x32x10xf32> to vector<1x32x10xf32>
    %33 = vector.shape_cast %32 : vector<1x32x10xf32> to vector<32x10xf32>
    %34 = vector.extract_strided_slice %2 {offsets = [0, 0, 0], sizes = [1, 32, 1], strides = [1, 1, 1]} : vector<3x32x3xf32> to vector<1x32x1xf32>
    %35 = vector.shape_cast %34 : vector<1x32x1xf32> to vector<32x1xf32>
    %36 = vector.broadcast %35 : vector<32x1xf32> to vector<32x10xf32>
    %37 = arith.mulf %33, %36 : vector<32x10xf32>
    %38 = vector.extract_strided_slice %11 {offsets = [1, 0, 0], sizes = [1, 32, 10], strides = [1, 1, 1]} : vector<3x32x10xf32> to vector<1x32x10xf32>
    %39 = vector.shape_cast %38 : vector<1x32x10xf32> to vector<32x10xf32>
    %40 = vector.extract_strided_slice %2 {offsets = [1, 0, 0], sizes = [1, 32, 1], strides = [1, 1, 1]} : vector<3x32x3xf32> to vector<1x32x1xf32>
    %41 = vector.shape_cast %40 : vector<1x32x1xf32> to vector<32x1xf32>
    %42 = vector.broadcast %41 : vector<32x1xf32> to vector<32x10xf32>
    %43 = arith.mulf %39, %42 : vector<32x10xf32>
    %44 = arith.addf %37, %43 : vector<32x10xf32>
    %45 = vector.extract_strided_slice %11 {offsets = [2, 0, 0], sizes = [1, 32, 10], strides = [1, 1, 1]} : vector<3x32x10xf32> to vector<1x32x10xf32>
    %46 = vector.shape_cast %45 : vector<1x32x10xf32> to vector<32x10xf32>
    %47 = vector.extract_strided_slice %2 {offsets = [2, 0, 0], sizes = [1, 32, 1], strides = [1, 1, 1]} : vector<3x32x3xf32> to vector<1x32x1xf32>
    %48 = vector.shape_cast %47 : vector<1x32x1xf32> to vector<32x1xf32>
    %49 = vector.broadcast %48 : vector<32x1xf32> to vector<32x10xf32>
    %50 = arith.mulf %46, %49 : vector<32x10xf32>
    %51 = arith.addf %44, %50 : vector<32x10xf32>
    %52 = vector.extract_strided_slice %11 {offsets = [0, 0, 0], sizes = [1, 32, 10], strides = [1, 1, 1]} : vector<3x32x10xf32> to vector<1x32x10xf32>
    %53 = vector.shape_cast %52 : vector<1x32x10xf32> to vector<32x10xf32>
    %54 = vector.extract_strided_slice %2 {offsets = [0, 0, 1], sizes = [1, 32, 1], strides = [1, 1, 1]} : vector<3x32x3xf32> to vector<1x32x1xf32>
    %55 = vector.shape_cast %54 : vector<1x32x1xf32> to vector<32x1xf32>
    %56 = vector.broadcast %55 : vector<32x1xf32> to vector<32x10xf32>
    %57 = arith.mulf %53, %56 : vector<32x10xf32>
    %58 = vector.extract_strided_slice %11 {offsets = [1, 0, 0], sizes = [1, 32, 10], strides = [1, 1, 1]} : vector<3x32x10xf32> to vector<1x32x10xf32>
    %59 = vector.shape_cast %58 : vector<1x32x10xf32> to vector<32x10xf32>
    %60 = vector.extract_strided_slice %2 {offsets = [1, 0, 1], sizes = [1, 32, 1], strides = [1, 1, 1]} : vector<3x32x3xf32> to vector<1x32x1xf32>
    %61 = vector.shape_cast %60 : vector<1x32x1xf32> to vector<32x1xf32>
    %62 = vector.broadcast %61 : vector<32x1xf32> to vector<32x10xf32>
    %63 = arith.mulf %59, %62 : vector<32x10xf32>
    %64 = arith.addf %57, %63 : vector<32x10xf32>
    %65 = vector.extract_strided_slice %11 {offsets = [2, 0, 0], sizes = [1, 32, 10], strides = [1, 1, 1]} : vector<3x32x10xf32> to vector<1x32x10xf32>
    %66 = vector.shape_cast %65 : vector<1x32x10xf32> to vector<32x10xf32>
    %67 = vector.extract_strided_slice %2 {offsets = [2, 0, 1], sizes = [1, 32, 1], strides = [1, 1, 1]} : vector<3x32x3xf32> to vector<1x32x1xf32>
    %68 = vector.shape_cast %67 : vector<1x32x1xf32> to vector<32x1xf32>
    %69 = vector.broadcast %68 : vector<32x1xf32> to vector<32x10xf32>
    %70 = arith.mulf %66, %69 : vector<32x10xf32>
    %71 = arith.addf %64, %70 : vector<32x10xf32>
    %72 = vector.extract_strided_slice %11 {offsets = [0, 0, 0], sizes = [1, 32, 10], strides = [1, 1, 1]} : vector<3x32x10xf32> to vector<1x32x10xf32>
    %73 = vector.shape_cast %72 : vector<1x32x10xf32> to vector<32x10xf32>
    %74 = vector.extract_strided_slice %2 {offsets = [0, 0, 2], sizes = [1, 32, 1], strides = [1, 1, 1]} : vector<3x32x3xf32> to vector<1x32x1xf32>
    %75 = vector.shape_cast %74 : vector<1x32x1xf32> to vector<32x1xf32>
    %76 = vector.broadcast %75 : vector<32x1xf32> to vector<32x10xf32>
    %77 = arith.mulf %73, %76 : vector<32x10xf32>
    %78 = vector.extract_strided_slice %11 {offsets = [1, 0, 0], sizes = [1, 32, 10], strides = [1, 1, 1]} : vector<3x32x10xf32> to vector<1x32x10xf32>
    %79 = vector.shape_cast %78 : vector<1x32x10xf32> to vector<32x10xf32>
    %80 = vector.extract_strided_slice %2 {offsets = [1, 0, 2], sizes = [1, 32, 1], strides = [1, 1, 1]} : vector<3x32x3xf32> to vector<1x32x1xf32>
    %81 = vector.shape_cast %80 : vector<1x32x1xf32> to vector<32x1xf32>
    %82 = vector.broadcast %81 : vector<32x1xf32> to vector<32x10xf32>
    %83 = arith.mulf %79, %82 : vector<32x10xf32>
    %84 = arith.addf %77, %83 : vector<32x10xf32>
    %85 = vector.extract_strided_slice %11 {offsets = [2, 0, 0], sizes = [1, 32, 10], strides = [1, 1, 1]} : vector<3x32x10xf32> to vector<1x32x10xf32>
    %86 = vector.shape_cast %85 : vector<1x32x10xf32> to vector<32x10xf32>
    %87 = vector.extract_strided_slice %2 {offsets = [2, 0, 2], sizes = [1, 32, 1], strides = [1, 1, 1]} : vector<3x32x3xf32> to vector<1x32x1xf32>
    %88 = vector.shape_cast %87 : vector<1x32x1xf32> to vector<32x1xf32>
    %89 = vector.broadcast %88 : vector<32x1xf32> to vector<32x10xf32>
    %90 = arith.mulf %86, %89 : vector<32x10xf32>
    %91 = arith.addf %84, %90 : vector<32x10xf32>
    %92 = tpu.concatenate %0, %31, %51, %71, %91 in 1 : vector<32x80xf32>, vector<32x10xf32>, vector<32x10xf32>, vector<32x10xf32>, vector<32x10xf32> -> vector<32x120xf32>
    %cst_20 = arith.constant dense<0.000000e+00> : vector<32x32xf32>
    %93 = tpu.matmul %92, %4, %cst_20 {dimension_numbers = #tpu.dot_dimension_numbers<[1], [0], [0], [1], [0, 0, 1, 1], [], []>} : vector<32x120xf32>, vector<120x32xf32>, vector<32x32xf32> -> vector<32x32xf32>
    %94 = vector.broadcast %5 : vector<1x32xf32> to vector<32x32xf32>
    %95 = arith.addf %93, %94 : vector<32x32xf32>
    %96 = arith.negf %95 : vector<32x32xf32>
    %97 = math.exp %96 : vector<32x32xf32>
    %cst_21 = arith.constant 1.000000e+00 : f32
    %98 = vector.broadcast %cst_21 : f32 to vector<32x32xf32>
    %99 = arith.addf %98, %97 : vector<32x32xf32>
    %100 = arith.divf %98, %99 : vector<32x32xf32>
    %101 = arith.mulf %95, %100 : vector<32x32xf32>
    %cst_22 = arith.constant dense<0.000000e+00> : vector<32x4xf32>
    %102 = tpu.matmul %101, %7, %cst_22 {dimension_numbers = #tpu.dot_dimension_numbers<[1], [0], [0], [1], [0, 0, 1, 1], [], []>} : vector<32x32xf32>, vector<32x4xf32>, vector<32x4xf32> -> vector<32x4xf32>
    %103 = vector.broadcast %8 : vector<1x4xf32> to vector<32x4xf32>
    %104 = arith.addf %102, %103 : vector<32x4xf32>
    %105 = arith.negf %104 : vector<32x4xf32>
    %106 = math.exp %105 : vector<32x4xf32>
    %cst_23 = arith.constant 1.000000e+00 : f32
    %107 = vector.broadcast %cst_23 : f32 to vector<32x4xf32>
    %108 = arith.addf %107, %106 : vector<32x4xf32>
    %109 = arith.divf %107, %108 : vector<32x4xf32>
    %cst_24 = arith.constant dense<0.000000e+00> : vector<96x4xf32>
    %110 = tpu.matmul %10, %6, %cst_24 {dimension_numbers = #tpu.dot_dimension_numbers<[1], [0], [0], [1], [0, 0, 1, 1], [], []>} : vector<96x10xf32>, vector<10x4xf32>, vector<96x4xf32> -> vector<96x4xf32>
    %111 = vector.shape_cast %110 : vector<96x4xf32> to vector<3x32x4xf32>
    %112 = vector.shape_cast %109 : vector<32x4xf32> to vector<1x32x4xf32>
    %113 = vector.broadcast %112 : vector<1x32x4xf32> to vector<3x32x4xf32>
    %114 = arith.mulf %111, %113 : vector<3x32x4xf32>
    %c0_25 = arith.constant 0 : index
    %c0_26 = arith.constant 0 : index
    %115 = vector.load %arg10[%c0_25, %c0_26] : memref<32x1xf32, #tpu.memory_space<vmem>>, vector<32x1xf32>
    %cst_27 = arith.constant dense<0.000000e+00> : vector<32x1xf32>
    %116 = tpu.matmul %101, %115, %cst_27 {dimension_numbers = #tpu.dot_dimension_numbers<[1], [0], [0], [1], [0, 0, 1, 1], [], []>} : vector<32x32xf32>, vector<32x1xf32>, vector<32x1xf32> -> vector<32x1xf32>
    %c0_28 = arith.constant 0 : index
    %c0_29 = arith.constant 0 : index
    %117 = vector.load %arg11[%c0_28, %c0_29] : memref<1x1xf32, #tpu.memory_space<vmem>>, vector<1x1xf32>
    %118 = vector.broadcast %117 : vector<1x1xf32> to vector<32x1xf32>
    %119 = arith.addf %116, %118 : vector<32x1xf32>
    %120 = arith.negf %119 : vector<32x1xf32>
    %121 = math.exp %120 : vector<32x1xf32>
    %cst_30 = arith.constant 1.000000e+00 : f32
    %122 = vector.broadcast %cst_30 : f32 to vector<32x1xf32>
    %123 = arith.addf %122, %121 : vector<32x1xf32>
    %124 = arith.divf %122, %123 : vector<32x1xf32>
    %125 = vector.broadcast %124 : vector<32x1xf32> to vector<32x32xf32>
    %126 = arith.mulf %125, %101 : vector<32x32xf32>
    %127 = vector.extract_strided_slice %114 {offsets = [0, 0, 0], sizes = [1, 32, 4], strides = [1, 1, 1]} : vector<3x32x4xf32> to vector<1x32x4xf32>
    %128 = vector.shape_cast %127 : vector<1x32x4xf32> to vector<32x4xf32>
    %129 = vector.extract_strided_slice %114 {offsets = [1, 0, 0], sizes = [1, 32, 4], strides = [1, 1, 1]} : vector<3x32x4xf32> to vector<1x32x4xf32>
    %130 = vector.shape_cast %129 : vector<1x32x4xf32> to vector<32x4xf32>
    %131 = vector.extract_strided_slice %114 {offsets = [2, 0, 0], sizes = [1, 32, 4], strides = [1, 1, 1]} : vector<3x32x4xf32> to vector<1x32x4xf32>
    %132 = vector.shape_cast %131 : vector<1x32x4xf32> to vector<32x4xf32>
    %133 = tpu.concatenate %126, %128, %130, %132 in 1 : vector<32x32xf32>, vector<32x4xf32>, vector<32x4xf32>, vector<32x4xf32> -> vector<32x44xf32>
    %c0_31 = arith.constant 0 : index
    %c0_32 = arith.constant 0 : index
    %134 = vector.load %arg12[%c0_31, %c0_32] : memref<32x44xf32, #tpu.memory_space<vmem>>, vector<32x44xf32>
    tpu.vector_store %arg12[%c0_31, %c0_32], %133 {strides = array<i32>} : memref<32x44xf32, #tpu.memory_space<vmem>>, vector<32x44xf32>,
    return
  }
  func.func @transform_0(%arg0: i32) -> (i32, i32) {
    %c0_i32 = arith.constant 0 : i32
    %c0_i32_0 = arith.constant 0 : i32
    return %arg0, %c0_i32 : i32, i32
  }
  func.func @transform_1(%arg0: i32) -> (i32, i32, i32) {
    %c0_i32 = arith.constant 0 : i32
    %c0_i32_0 = arith.constant 0 : i32
    %c0_i32_1 = arith.constant 0 : i32
    return %c0_i32, %arg0, %c0_i32_0 : i32, i32, i32
  }
  func.func @transform_2(%arg0: i32) -> (i32, i32, i32) {
    %c0_i32 = arith.constant 0 : i32
    %c0_i32_0 = arith.constant 0 : i32
    %c0_i32_1 = arith.constant 0 : i32
    return %c0_i32, %arg0, %c0_i32_0 : i32, i32, i32
  }
  func.func @transform_3(%arg0: i32) -> (i32, i32) {
    %c0_i32 = arith.constant 0 : i32
    %c0_i32_0 = arith.constant 0 : i32
    %c0_i32_1 = arith.constant 0 : i32
    return %c0_i32, %c0_i32_0 : i32, i32
  }
  func.func @transform_4(%arg0: i32) -> (i32, i32) {
    %c0_i32 = arith.constant 0 : i32
    %c0_i32_0 = arith.constant 0 : i32
    %c0_i32_1 = arith.constant 0 : i32
    return %c0_i32, %c0_i32_0 : i32, i32
  }
  func.func @transform_5(%arg0: i32) -> (i32, i32) {
    %c0_i32 = arith.constant 0 : i32
    %c0_i32_0 = arith.constant 0 : i32
    %c0_i32_1 = arith.constant 0 : i32
    return %c0_i32, %c0_i32_0 : i32, i32
  }
  func.func @transform_6(%arg0: i32) -> (i32, i32) {
    %c0_i32 = arith.constant 0 : i32
    %c0_i32_0 = arith.constant 0 : i32
    %c0_i32_1 = arith.constant 0 : i32
    return %c0_i32, %c0_i32_0 : i32, i32
  }
  func.func @transform_7(%arg0: i32) -> (i32, i32) {
    %c0_i32 = arith.constant 0 : i32
    %c0_i32_0 = arith.constant 0 : i32
    %c0_i32_1 = arith.constant 0 : i32
    return %c0_i32, %c0_i32_0 : i32, i32
  }
  func.func @transform_8(%arg0: i32) -> (i32, i32) {
    %c0_i32 = arith.constant 0 : i32
    %c0_i32_0 = arith.constant 0 : i32
    %c0_i32_1 = arith.constant 0 : i32
    return %c0_i32, %c0_i32_0 : i32, i32
  }
  func.func @transform_9(%arg0: i32) -> (i32, i32) {
    %c0_i32 = arith.constant 0 : i32
    %c0_i32_0 = arith.constant 0 : i32
    %c0_i32_1 = arith.constant 0 : i32
    return %c0_i32, %c0_i32_0 : i32, i32
  }
  func.func @transform_10(%arg0: i32) -> (i32, i32) {
    %c0_i32 = arith.constant 0 : i32
    %c0_i32_0 = arith.constant 0 : i32
    %c0_i32_1 = arith.constant 0 : i32
    return %c0_i32, %c0_i32_0 : i32, i32
  }
  func.func @transform_11(%arg0: i32) -> (i32, i32) {
    %c0_i32 = arith.constant 0 : i32
    %c0_i32_0 = arith.constant 0 : i32
    return %arg0, %c0_i32 : i32, i32
  }
}

</mosaic_0001>

<bundles_post_ra>
// kernel: tpu_custom_call.1
= control target key start
LH: loop header
LB: loop body
LE: loop exit
PB: predicated region body
PF: predicated region fallthrough
CT: control target
= control target key end

     0   :  { %s2248_s0 = inlined_call_operand.vmem [shape: f32[32,80], index: 0, kind: input, shape index: {}]   ;;  %s2249_s1 = inlined_call_operand.vmem [shape: f32[3,32,10], index: 1, kind: input, shape index: {}]   ;;  %s2250_s2 = inlined_call_operand.vmem [shape: f32[3,32,3], index: 2, kind: input, shape index: {}]   ;;  %s2251_s3 = inlined_call_operand.vmem [shape: f32[10,10], index: 3, kind: input, shape index: {}]   ;;  %s2252_s4 = inlined_call_operand.vmem [shape: f32[120,32], index: 4, kind: input, shape index: {}]   ;;  %s2253_s5 = inlined_call_operand.vmem [shape: f32[1,32], index: 5, kind: input, shape index: {}]   ;;  %s2254_s6 = inlined_call_operand.vmem [shape: f32[10,4], index: 6, kind: input, shape index: {}]   ;;  %s2255_s7 = inlined_call_operand.vmem [shape: f32[32,4], index: 7, kind: input, shape index: {}]   ;;  %s2256_s8 = inlined_call_operand.vmem [shape: f32[1,4], index: 8, kind: input, shape index: {}]   ;;  %s2257_s9 = inlined_call_operand.vmem [shape: f32[32,1], index: 9, kind: input, shape index: {}]   ;;  %s2258_s10 = inlined_call_operand.<no memory space> [shape: f32[1,1], index: 10, kind: input, shape index: {}]   ;;  %s2259_s11 = inlined_call_operand.hbm [shape: f32[32,44], index: 11, kind: output, shape index: {}]  }
   0x1   :  { %v16_v0 = vstv %s2258_s10 }
   0x2   :  { %17 = vst [vmem:[#allocation2] sm:$0x1] %v16_v0 }
   0x3   :  { %v69_v1 = vld [vmem:[%s2251_s3] sm:$0xff]  ;;  %v70_v2 = vld [vmem:[%s2251_s3 + $0x8] sm:$0x3]  ;;  %vm131_vm0 = vcmask 1041408   ;;  %v1674_v3 = vmov 0   ;;  %vm1675_vm1 = vmmov 1  }
   0x4   :  { %1574 = vset.pattern.permute.xlu1 %v1674_v3  ;;  %v1499_v4 = vpack.c.bf16 %v70_v2, %v69_v1  ;;  %vm1758_vm2 = vmpackc.low %vm131_vm0, %vm1675_vm1  ;;  %v58_v6 = vld [vmem:[%s2250_s2 + $0x8] sm:$0xff]  ;;  %v45_v7 = vld [vmem:[%s2249_s1] sm:$0xff]  ;;  %vm94_vm3 = vcmask 80896   ;;  %1573 = vset.pattern.permute.xlu0 %v1674_v3 }
   0x5   :  { %319 = vperm.xlu1 %1574, %v58_v6   ;;  %1395 = vmatprep.mubr.msk.f32.mxu1 %vm94_vm3, %v45_v7  ;;  %v62_v8 = vld [vmem:[%s2250_s2 + $0x28] sm:$0xff]  ;;  %v47_v10 = vld [vmem:[%s2249_s1 + $0x10] sm:$0xff]  ;;  %v57_v11 = vld [vmem:[%s2250_s2] sm:$0xff] }
   0x6   :  { %1501 = vmatprep.subr.msk.bf16.mxu1 %vm1758_vm2, %v1499_v4  ;;  %v46_v9 = vld [vmem:[%s2249_s1 + $0x8] sm:$0xff]  ;;  %v48_v12 = vld [vmem:[%s2249_s1 + $0x18] sm:$0xff]  ;;  %v61_v13 = vld [vmem:[%s2250_s2 + $0x20] sm:$0xff]  ;;  %314 = vperm.xlu0 %1573, %v57_v11  }
   0x7   :  { %1504 = vmatpush3.bf16.msk.msra.mxu1 %vm1758_vm2, %v1499_v4  ;;  %v49_v14 = vld [vmem:[%s2249_s1 + $0x20] sm:$0xff] }
   0x9   :  { %343 = vperm.xlu1 %1574, %v62_v8  }
   0xa   :  { %1396 = vmatmul.mubr.msk.f32.vlgmr.msra.gmra.mrb[0].mxu1 %vm94_vm3, %v46_v9 }
   0xb   :  { %1398 = vmatprep.mubr.msk.f32.mxu1 %vm94_vm3, %v47_v10 }
   0xc   :  { %18 = vsyncpa [#allocation4], 0  ;;  %v1676_v15 = vmov 1   ;;  %v50_v16 = vld [vmem:[%s2249_s1 + $0x28] sm:$0xff]  ;;  %338 = vperm.xlu0 %1573, %v61_v13   ;;  %v65_v17 = vld [vmem:[%s2250_s2 + $0x40] sm:$0xff]  ;;  %v1677_v26 = vmov 2  }
   0xd   :  { %1575 = vset.pattern.permute.xlu1 %v1676_v15  ;;  %v51_v18 = vld [vmem:[%s2249_s1 + $0x30] sm:$0xff]  ;;  %v52_v20 = vld [vmem:[%s2249_s1 + $0x38] sm:$0xff]  ;;  %v53_v21 = vld [vmem:[%s2249_s1 + $0x40] sm:$0xff]  ;;  %s1678_s14 = smov 110   ;;  %s1679_s15 = smov 90   ;;  %vm592_vm12 = vcmask 654336  }
   0xe   :  { %1399 = vmatmul.mubr.msk.f32.gmra.mrb[2].mxu1 %vm94_vm3, %v48_v12  ;;  %413 = vperm.xlu1 %1575, %v61_v13   ;;  %v59_v19 = vld [vmem:[%s2250_s2 + $0x10] sm:$0xff]  ;;  %v54_v23 = vld [vmem:[%s2249_s1 + $0x48] sm:$0xff]  ;;  %v56_v25 = vld [vmem:[%s2249_s1 + $0x58] sm:$0xff]  ;;  %s1680_s16 = smov 100   ;;  %s1681_s29 = smov 80   ;;  %vm597_vm13 = vcmask 736256  }
   0xf   :  { %1401 = vmatprep.mubr.msk.f32.mxu1 %vm94_vm3, %v49_v14  ;;  %v67_v22 = vld [vmem:[%s2250_s2 + $0x50] sm:$0xff]  ;;  %v66_v27 = vld [vmem:[%s2250_s2 + $0x48] sm:$0xff]  ;;  %v68_v29 = vld [vmem:[%s2250_s2 + $0x58] sm:$0xff]  ;;  %vm602_vm14 = vcmask 818176   ;;  %vm607_vm15 = vcmask 900096   ;;  %vm618_vm0 = vcmask 982016  }
  0x10   :  { %324 = vperm.xlu0 %1573, %v59_v19   ;;  %v55_v24 = vld [vmem:[%s2249_s1 + $0x50] sm:$0xff]  ;;  %v60_v30 = vld [vmem:[%s2250_s2 + $0x18] sm:$0xff]  ;;  %v71_v36 = vld [vmem:[%s2252_s4] sm:$0xff]  ;;  %vm750_vm1 = vcmask 261120   ;;  %s1685_s1 = smov [#allocation3]  }
  0x11   :  { %v63_v28 = vld [vmem:[%s2250_s2 + $0x30] sm:$0xff]  ;;  %v64_v31 = vld [vmem:[%s2250_s2 + $0x38] sm:$0xff]  ;;  %v72_v37 = vld [vmem:[%s2252_s4 + $0x8] sm:$0xff]  ;;  %s1264_s21 = sshll.u32 %s1685_s1, 4  ;;  %s1265_s21 = int_to_ptr.vmem [resolvable:$true] %s1264_s21 }
  0x12   :  { %1402 = vmatmul.mubr.msk.f32.gmra.mrb[4].mxu1 %vm94_vm3, %v50_v16  ;;  %1576 = vset.pattern.permute.xlu1 %v1674_v3  ;;  %v1505_v38 = vpack.c.bf16 %v72_v37, %v71_v36  ;;  %v1297_v5 = vld [vmem:[%s2256_s8] ss:$0 sm:$0xff]  ;;  %s1682_s8 = smov 32   ;;  %s1650_s22 = scalar_lea.vmem %s1265_s21, 512 }
  0x13   :  { %366 = vperm.xlu1 %1576, %v65_v17   ;;  %1404 = vmatprep.mubr.msk.f32.mxu1 %vm94_vm3, %v51_v18  ;;  %p1651_p0 = scmp.ne.s32.totalorder %s1265_s21, %s1650_s22  ;;  %p1655_p1 = scmp.lt.s32.totalorder %s1265_s21, %s1265_s21 }
  0x14   :  { %376 = vperm.xlu0 %1573, %v67_v22   ;;  %1506 = vmatprep.subr.bf16.mxu1 %v1505_v38  ;;  %p1656_p2 = scmp.lt.s32.totalorder %s1650_s22, %s1650_s22 }
  0x15   :  { %1508 = vmatpush3.bf16.msra.mxu1 %v1505_v38 }
  0x16   :  { %1405 = vmatmul.mubr.msk.f32.gmra.mrb[6].mxu1 %vm94_vm3, %v52_v20  ;;  %p1657_p3 = por %p1656_p2, %p1655_p1 }
  0x17   :  { %1577 = vset.pattern.permute.xlu1 %v1676_v15  ;;  %1407 = vmatprep.mubr.msk.f32.mxu1 %vm94_vm3, %v53_v21 }
  0x18   :  { %417 = vperm.xlu1 %1577, %v62_v8   ;;  %1586 = vset.pattern.permute.xlu0 %v1676_v15  ;;  %p1658_p4 = pnand %p1657_p3, %p1651_p0 }
  0x19   :  { %393 = vperm.xlu0 %1586, %v57_v11  }
  0x1a   :  { %1408 = vmatmul.mubr.msk.f32.gmra.mrb[8].mxu1 %vm94_vm3, %v54_v23  ;;  %v74_v23 = vld [vmem:[%s2252_s4 + $0x18] sm:$0xff] }
  0x1b   :  { %1410 = vmatprep.mubr.msk.f32.mxu1 %vm94_vm3, %v55_v24 }
  0x1c   :  { %1578 = vset.pattern.permute.xlu1 %v1677_v26 }
  0x1d   :  { %481 = vperm.xlu1 %1578, %v61_v13   ;;  %397 = vperm.xlu0 %1586, %v58_v6  }
  0x1e   :  { %1411 = vmatmul.mubr.msk.f32.gmra.mrb[10].mxu1 %vm94_vm3, %v56_v25 }
  0x21   :  { %1579 = vset.pattern.permute.xlu1 %v1674_v3  ;;  %437 = vperm.xlu0 %1586, %v65_v17  }
  0x22   :  { %371 = vperm.xlu1 %1579, %v66_v27  }
  0x25   :  { %401 = vperm.xlu0 %1586, %v59_v19  }
  0x26   :  { %1580 = vset.pattern.permute.xlu1 %v1677_v26 }
  0x27   :  { %465 = vperm.xlu1 %1580, %v58_v6  }
  0x29   :  { %445 = vperm.xlu0 %1586, %v67_v22  }
  0x2b   :  { %485 = vperm.xlu1 %1580, %v62_v8  }
  0x2d   :  { %449 = vperm.xlu0 %1586, %v68_v29  }
  0x2f   :  { %1581 = vset.pattern.permute.xlu1 %v1674_v3 }
  0x30   :  { %348 = vperm.xlu1 %1581, %v63_v28  }
  0x31   :  { %1591 = vset.pattern.permute.xlu0 %v1677_v26 }
  0x32   :  { %461 = vperm.xlu0 %1591, %v57_v11  }
  0x34   :  { %1582 = vset.pattern.permute.xlu1 %v1676_v15 }
  0x35   :  { %441 = vperm.xlu1 %1582, %v66_v27  }
  0x36   :  { %505 = vperm.xlu0 %1591, %v65_v17  }
  0x39   :  { %1583 = vset.pattern.permute.xlu1 %v1674_v3 }
  0x3a   :  { %329 = vperm.xlu1 %1583, %v60_v30   ;;  %469 = vperm.xlu0 %1591, %v59_v19  }
  0x3e   :  { %353 = vperm.xlu1 %1583, %v64_v31   ;;  %517 = vperm.xlu0 %1591, %v68_v29  }
  0x42   :  { %1584 = vset.pattern.permute.xlu1 %v1676_v15  ;;  %1592 = vset.pattern.permute.xlu0 %v1674_v3 }
  0x43   :  { %421 = vperm.xlu1 %1584, %v63_v28  }
  0x47   :  { %1585 = vset.pattern.permute.xlu1 %v1677_v26 }
  0x48   :  { %509 = vperm.xlu1 %1585, %v66_v27  }
  0x4c   :  { %1587 = vset.pattern.permute.xlu1 %v1676_v15 }
  0x4d   :  { %405 = vperm.xlu1 %1587, %v60_v30  }
  0x51   :  { %425 = vperm.xlu1 %1587, %v64_v31  }
  0x55   :  { %1588 = vset.pattern.permute.xlu1 %v1677_v26 }
  0x56   :  { %489 = vperm.xlu1 %1588, %v63_v28  }
  0x5a   :  { %1589 = vset.pattern.permute.xlu1 %v1674_v3 }
  0x5b   :  { %381 = vperm.xlu1 %1589, %v68_v29  }
  0x5f   :  { %1590 = vset.pattern.permute.xlu1 %v1677_v26 }
  0x60   :  { %473 = vperm.xlu1 %1590, %v60_v30  }
  0x64   :  { %493 = vperm.xlu1 %1590, %v64_v31  }
  0x68   :  { %513 = vperm.xlu1 %1590, %v67_v22   ;;  %v73_v22 = vld [vmem:[%s2252_s4 + $0x10] sm:$0xff] }
  0x69   :  { %v1509_v28 = vpack.c.bf16 %v74_v23, %v73_v22 }
  0x6b   :  { %1510 = vmatprep.subr.bf16.mxu1 %v1509_v28 }
  0x6c   :  { %1593 = vset.pattern.permute.xlu1 %v1674_v3  ;;  %1512 = vmatpush3.bf16.msra.mxu1 %v1509_v28 }
  0x84   :  { %v320_v32 = vpop.permute.xlu1 %319 }
  0x85   :  { %v315_v40 = vpop.permute.xlu0 %314 }
  0x88   :  { %v1864_v33 = vpop.permute.xlu1 %343 }
  0x8b   :  { %v339_v42 = vpop.permute.xlu0 %338 }
  0x8d   :  { %v1866_v34 = vpop.permute.xlu1 %413 }
  0x8f   :  { %v325_v45 = vpop.permute.xlu0 %324 }
  0x92   :  { %v1868_v35 = vpop.permute.xlu1 %366 }
  0x93   :  { %v1878_v47 = vpop.permute.xlu0 %376 }
  0x97   :  { %v418_v39 = vpop.permute.xlu1 %417 }
  0x98   :  { %v394_v49 = vpop.permute.xlu0 %393 }
  0x9c   :  { %v482_v41 = vpop.permute.xlu1 %481  ;;  %v398_v51 = vpop.permute.xlu0 %397 }
  0xa0   :  { %v1884_v54 = vpop.permute.xlu0 %437 }
  0xa1   :  { %v1876_v43 = vpop.permute.xlu1 %371 }
  0xa4   :  { %v402_v56 = vpop.permute.xlu0 %401 }
  0xa6   :  { %v466_v44 = vpop.permute.xlu1 %465 }
  0xa8   :  { %v1890_v58 = vpop.permute.xlu0 %445 }
  0xaa   :  { %v486_v46 = vpop.permute.xlu1 %485 }
  0xac   :  { %v1892_v61 = vpop.permute.xlu0 %449 }
  0xaf   :  { %v1880_v48 = vpop.permute.xlu1 %348 }
  0xb1   :  { %v462_v63 = vpop.permute.xlu0 %461 }
  0xb4   :  { %v1882_v50 = vpop.permute.xlu1 %441 }
  0xb5   :  { %v1896_v1 = vpop.permute.xlu0 %505 }
  0xb9   :  { %v330_v52 = vpop.permute.xlu1 %329  ;;  %v470_v9 = vpop.permute.xlu0 %469 }
  0xbd   :  { %v354_v53 = vpop.permute.xlu1 %353 }
  0xc2   :  { %v1886_v55 = vpop.permute.xlu1 %421 }
  0xc7   :  { %v1888_v57 = vpop.permute.xlu1 %509 }
  0xcc   :  { %v406_v59 = vpop.permute.xlu1 %405 }
  0xd0   :  { %v426_v60 = vpop.permute.xlu1 %425 }
  0xd5   :  { %v490_v62 = vpop.permute.xlu1 %489 }
  0xda   :  { %v1894_v0 = vpop.permute.xlu1 %381 }
  0xdd   :  { %v1898_v2 = vpop.f32.mrb[0].mxu1 }
  0xde   :  { %v1900_v3 = vpop.f32.mrb[1].mxu1  ;;  %v261_v4 = vmul.f32 %v1898_v2, %v1898_v2  ;;  %v477_v11 = vmul.f32 %v1898_v2, %v466_v44  ;;  %v333_v12 = vmul.f32 %v1898_v2, %v320_v32  ;;  %v409_v13 = vmul.f32 %v1898_v2, %v398_v51 }
  0xdf   :  { %v474_v6 = vpop.permute.xlu1 %473  ;;  %v260_v8 = vmul.f32 %v1900_v3, %v1900_v3  ;;  %v332_v15 = vmul.f32 %v315_v40, %v1900_v3  ;;  %v408_v16 = vmul.f32 %v394_v49, %v1900_v3  ;;  %v476_v17 = vmul.f32 %v462_v63, %v1900_v3 }
  0xe1   :  { %v1904_v7 = vpop.f32.mrb[2].mxu1 }
  0xe2   :  { %v1908_v10 = vpop.f32.mrb[3].mxu1  ;;  %v263_v14 = vmul.f32 %v1904_v7, %v1904_v7  ;;  %v335_v19 = vmul.f32 %v1904_v7, %v330_v52  ;;  %v411_v20 = vmul.f32 %v1904_v7, %v406_v59  ;;  %v479_v21 = vmul.f32 %v1904_v7, %v474_v6 }
  0xe3   :  { %v262_v18 = vmul.f32 %v1908_v10, %v1908_v10  ;;  %v334_v25 = vmul.f32 %v325_v45, %v1908_v10  ;;  %v410_v26 = vmul.f32 %v402_v56, %v1908_v10  ;;  %v478_v27 = vmul.f32 %v470_v9, %v1908_v10  ;;  %v494_v38 = vpop.permute.xlu1 %493 }
  0xe5   :  { %v1929_v24 = vpop.f32.mrb[4].mxu1 }
  0xe6   :  { %v265_v29 = vmul.f32 %v1929_v24, %v1929_v24  ;;  %v1936_v30 = vpop.f32.mrb[5].mxu1  ;;  %v497_v31 = vmul.f32 %v1929_v24, %v486_v46  ;;  %v357_v32 = vmul.f32 %v1929_v24, %v1864_v33  ;;  %v429_v36 = vmul.f32 %v1929_v24, %v418_v39 }
  0xe7   :  { %v264_v37 = vmul.f32 %v1936_v30, %v1936_v30  ;;  %v356_v40 = vmul.f32 %v339_v42, %v1936_v30  ;;  %v428_v44 = vmul.f32 %v1866_v34, %v1936_v30  ;;  %v496_v45 = vmul.f32 %v482_v41, %v1936_v30 }
  0xe8   :  { %v269_v49 = vadd.f32 %v265_v29, %v261_v4  ;;  %v501_v51 = vadd.f32 %v497_v31, %v477_v11  ;;  %v361_v46 = vadd.f32 %v357_v32, %v333_v12  ;;  %v433_v52 = vadd.f32 %v429_v36, %v409_v13 }
  0xe9   :  { %v268_v33 = vadd.f32 %v264_v37, %v260_v8  ;;  %v1948_v56 = vpop.f32.mrb[6].mxu1  ;;  %v360_v39 = vadd.f32 %v356_v40, %v332_v15  ;;  %v432_v59 = vadd.f32 %v428_v44, %v408_v16  ;;  %v500_v63 = vadd.f32 %v496_v45, %v476_v17 }
  0xea   :  { %v267_v42 = vmul.f32 %v1948_v56, %v1948_v56  ;;  %v1952_v6 = vpop.f32.mrb[7].mxu1  ;;  %v359_v34 = vmul.f32 %v1948_v56, %v354_v53  ;;  %v431_v41 = vmul.f32 %v1948_v56, %v426_v60  ;;  %v499_v4 = vmul.f32 %v1948_v56, %v494_v38 }
  0xeb   :  { %v266_v9 = vmul.f32 %v1952_v6, %v1952_v6  ;;  %v358_v8 = vmul.f32 %v1880_v48, %v1952_v6  ;;  %v430_v11 = vmul.f32 %v1886_v55, %v1952_v6  ;;  %v498_v12 = vmul.f32 %v490_v62, %v1952_v6 }
  0xec   :  { %v271_v13 = vadd.f32 %v267_v42, %v263_v14  ;;  %v363_v15 = vadd.f32 %v359_v34, %v335_v19  ;;  %v435_v16 = vadd.f32 %v431_v41, %v411_v20  ;;  %v1964_v17 = vadd.f32 %v499_v4, %v479_v21  ;;  %v76_v42 = vld [vmem:[%s2252_s4 + $0x28] sm:$0xff]  ;;  %v77_v41 = vld [vmem:[%s2252_s4 + $0x30] sm:$0xff]  ;;  %v78_v4 = vld [vmem:[%s2252_s4 + $0x38] sm:$0xff] }
  0xed   :  { %v270_v53 = vadd.f32 %v266_v9, %v262_v18  ;;  %v1966_v60 = vpop.f32.mrb[8].mxu1  ;;  %v362_v22 = vadd.f32 %v358_v8, %v334_v25  ;;  %v434_v23 = vadd.f32 %v430_v11, %v410_v26  ;;  %v502_v28 = vadd.f32 %v498_v12, %v478_v27 }
  0xee   :  { %v273_v29 = vmul.f32 %v1966_v60, %v1966_v60  ;;  %v1970_v48 = vpop.f32.mrb[9].mxu1  ;;  %v521_v55 = vmul.f32 %v1966_v60, %v1888_v57  ;;  %v385_v62 = vmul.f32 %v1966_v60, %v1876_v43  ;;  %v453_v14 = vmul.f32 %v1966_v60, %v1882_v50 }
  0xef   :  { %v272_v18 = vmul.f32 %v1970_v48, %v1970_v48  ;;  %v384_v19 = vmul.f32 %v1868_v35, %v1970_v48  ;;  %v452_v20 = vmul.f32 %v1884_v54, %v1970_v48  ;;  %v520_v21 = vmul.f32 %v1896_v1, %v1970_v48 }
  0xf0   :  { %v277_v25 = vadd.f32 %v273_v29, %v269_v49  ;;  %v525_v57 = vadd.f32 %v521_v55, %v501_v51  ;;  %v389_v26 = vadd.f32 %v385_v62, %v361_v46  ;;  %v457_v27 = vadd.f32 %v453_v14, %v433_v52  ;;  %v82_v29 = vld [vmem:[%s2252_s4 + $0x58] sm:$0xff] }
  0xf1   :  { %v276_v43 = vadd.f32 %v272_v18, %v268_v33  ;;  %v1986_v31 = vpop.f32.mrb[10].mxu1  ;;  %v388_v50 = vadd.f32 %v384_v19, %v360_v39  ;;  %v456_v32 = vadd.f32 %v452_v20, %v432_v59  ;;  %v524_v36 = vadd.f32 %v520_v21, %v500_v63  ;;  %v75_v63 = vld [vmem:[%s2252_s4 + $0x20] sm:$0xff] }
  0xf2   :  { %v1988_v37 = vadd.f32 1e-08, %v277_v25  ;;  %v275_v35 = vmul.f32 %v1986_v31, %v1986_v31  ;;  %582 = vrot.lane.b32.xlu0 %v525_v57, %s1678_s14  ;;  %550 = vrot.lane.b32.xlu1 %v389_v26, %s1679_s15  ;;  %v1994_v54 = vpop.f32.mrb[11].mxu1  ;;  %v387_v1 = vmul.f32 %v1986_v31, %v1894_v0  ;;  %v455_v38 = vmul.f32 %v1986_v31, %v1892_v61  ;;  %v514_v0 = vpop.permute.xlu1 %513  ;;  %v83_v57 = vld [vmem:[%s2252_s4 + $0x60] sm:$0xff]  ;;  %v84_v26 = vld [vmem:[%s2252_s4 + $0x68] sm:$0xff] }
  0xf3   :  { %v2000_v40 = vadd.f32 1e-08, %v276_v43  ;;  %v274_v44 = vmul.f32 %v1994_v54, %v1994_v54  ;;  %v386_v45 = vmul.f32 %v1878_v47, %v1994_v54  ;;  %v454_v49 = vmul.f32 %v1890_v58, %v1994_v54  ;;  %v518_v47 = vpop.permute.xlu0 %517 }
  0xf4   :  { %v279_v51 = vadd.f32 %v275_v35, %v271_v13  ;;  %v391_v46 = vadd.f32 %v387_v1, %v363_v15  ;;  %v459_v52 = vadd.f32 %v455_v38, %v435_v16  ;;  %1594 = vrsqrt.f32 %v1988_v37  ;;  %v79_v13 = vld [vmem:[%s2252_s4 + $0x40] sm:$0xff]  ;;  %v80_v15 = vld [vmem:[%s2252_s4 + $0x48] sm:$0xff] }
  0xf5   :  { %v278_v33 = vadd.f32 %v274_v44, %v270_v53  ;;  %v390_v39 = vadd.f32 %v386_v45, %v362_v22  ;;  %v458_v59 = vadd.f32 %v454_v49, %v434_v23  ;;  %1596 = vrsqrt.f32 %v2000_v40 }
  0xf6   :  { %v2009_v61 = vadd.f32 1e-08, %v279_v51  ;;  %566 = vrot.lane.b32.xlu1 %v457_v27, %s1680_s16  ;;  %548 = vrot.lane.b32.xlu0 %v388_v50, %s1679_s15  ;;  %v522_v34 = vmul.f32 %v514_v0, %v1994_v54  ;;  %v523_v8 = vmul.f32 %v1986_v31, %v518_v47  ;;  %v1513_v11 = vpack.c.bf16 %v76_v42, %v75_v63  ;;  %v41_v63 = vld [vmem:[%s2248_s0] sm:$0xff] }
  0xf7   :  { %v2014_v58 = vadd.f32 1e-08, %v278_v33  ;;  %v1517_v12 = vpack.c.bf16 %v78_v4, %v77_v41  ;;  %v1521_v22 = vpack.c.bf16 %v80_v15, %v79_v13  ;;  %vm293_vm4 = vcmp.eq.f32.partialorder %v1988_v37, inf }
  0xf8   :  { %1598 = vrsqrt.f32 %v2009_v61  ;;  %v526_v9 = vadd.f32 %v522_v34, %v502_v28  ;;  %v527_v16 = vadd.f32 %v523_v8, %v1964_v17  ;;  %1514 = vmatprep.subr.bf16.mxu1 %v1513_v11  ;;  %v81_v28 = vld [vmem:[%s2252_s4 + $0x50] sm:$0xff]  ;;  %v296_v55 = vand.u32 2147483648, %v1988_v37 }
  0xf9   :  { %1600 = vrsqrt.f32 %v2014_v58  ;;  %1516 = vmatpush3.bf16.msra.mxu1 %v1513_v11  ;;  %vm295_vm5 = vcmp.eq.f32.partialorder %v1988_v37, 0.0  ;;  %vm286_vm6 = vcmp.eq.f32.partialorder %v2000_v40, inf  ;;  %v1525_v20 = vpack.c.bf16 %v82_v29, %v81_v28  ;;  %v44_v11 = vld [vmem:[%s2248_s0 + $0x18] sm:$0xff] }
  0xfa   :  { %564 = vrot.lane.b32.xlu0 %v456_v32, %s1680_s16  ;;  %554 = vrot.lane.b32.xlu1 %v391_v46, %s1679_s15  ;;  %v289_v43 = vand.u32 2147483648, %v2000_v40  ;;  %vm288_vm7 = vcmp.eq.f32.partialorder %v2000_v40, 0.0  ;;  %vm307_vm8 = vcmp.eq.f32.partialorder %v2009_v61, inf  ;;  %v1529_v32 = vpack.c.bf16 %v84_v26, %v83_v57  ;;  %v90_v57 = vld [vmem:[%s2255_s7 + $0x8] sm:$0xff] }
  0xfb   :  { %1518 = vmatprep.subr.bf16.mxu1 %v1517_v12  ;;  %v310_v35 = vand.u32 2147483648, %v2009_v61  ;;  %vm309_vm9 = vcmp.eq.f32.partialorder %v2009_v61, 0.0  ;;  %vm300_vm10 = vcmp.eq.f32.partialorder %v2014_v58, inf  ;;  %v303_v44 = vand.u32 2147483648, %v2014_v58 }
  0xfc   :  { %vm302_vm11 = vcmp.eq.f32.partialorder %v2014_v58, 0.0 }
  0xfd   :  { %1520 = vmatpush3.bf16.msra.mxu1 %v1517_v12 }
  0xfe   :  { %v1595_v53 = vpop.eup %1594  ;;  %580 = vrot.lane.b32.xlu0 %v524_v36, %s1678_s14  ;;  %570 = vrot.lane.b32.xlu1 %v459_v52, %s1680_s16 }
  0xff   :  { %v292_v23 = vmul.f32 %v1595_v53, %v1988_v37  ;;  %v1597_v17 = vpop.eup %1596  ;;  %1522 = vmatprep.subr.bf16.mxu1 %v1521_v22 }
 0x100   :  { %v285_v14 = vmul.f32 %v1597_v17, %v2000_v40 }
 0x101   :  { %v294_v62 = vsel %vm293_vm4, %v1988_v37, %v292_v23  ;;  %1524 = vmatpush3.bf16.msra.mxu1 %v1521_v22  ;;  %v43_v23 = vld [vmem:[%s2248_s0 + $0x10] sm:$0xff]  ;;  %vm1254_vm4 = vcmask 359424  }
 0x102   :  { %v1599_v18 = vpop.eup %1598  ;;  %552 = vrot.lane.b32.xlu0 %v390_v39, %s1679_s15  ;;  %v297_v19 = vsel %vm295_vm5, %v296_v55, %v294_v62  ;;  %v287_v21 = vsel %vm286_vm6, %v2000_v40, %v285_v14  ;;  %1526 = vmatprep.subr.bf16.mxu1 %v1525_v20  ;;  %v85_v40 = vld [vmem:[%s2252_s4 + $0x70] sm:$0xff] }
 0x103   :  { %534 = vrot.lane.b32.xlu1 %v297_v19, %s1681_s29  ;;  %v306_v25 = vmul.f32 %v1599_v18, %v2009_v61  ;;  %v1601_v27 = vpop.eup %1600  ;;  %v290_v50 = vsel %vm288_vm7, %v289_v43, %v287_v21  ;;  %v92_v43 = vld [vmem:[%s2255_s7 + $0x18] sm:$0xff] }
 0x104   :  { %v299_v37 = vmul.f32 %v1601_v27, %v2014_v58  ;;  %v91_v27 = vld [vmem:[%s2255_s7 + $0x10] sm:$0xff] }
 0x105   :  { %v308_v36 = vsel %vm307_vm8, %v2009_v61, %v306_v25  ;;  %1528 = vmatpush3.bf16.msra.mxu1 %v1525_v20  ;;  %v89_v25 = vld [vmem:[%s2255_s7] sm:$0xff] }
 0x106   :  { %568 = vrot.lane.b32.xlu0 %v458_v59, %s1680_s16  ;;  %v311_v1 = vsel %vm309_vm9, %v310_v35, %v308_v36  ;;  %1530 = vmatprep.subr.bf16.mxu1 %v1529_v32  ;;  %v301_v38 = vsel %vm300_vm10, %v2014_v58, %v299_v37  ;;  %v42_v59 = vld [vmem:[%s2248_s0 + $0x8] sm:$0xff]  ;;  %v1533_v26 = vpack.c.bf16 %v90_v57, %v89_v25  ;;  %v87_v37 = vld [vmem:[%s2254_s6] sm:$0xff] }
 0x107   :  { %532 = vrot.lane.b32.xlu1 %v290_v50, %s1681_s29  ;;  %v304_v45 = vsel %vm302_vm11, %v303_v44, %v301_v38  ;;  %v1537_v50 = vpack.c.bf16 %v92_v43, %v91_v27  ;;  %v1049_v36 = vld [vmem:[%s2257_s9 + $0x8] sm:$0xff]  ;;  %v1050_v38 = vld [vmem:[%s2257_s9 + $0x10] sm:$0xff] }
 0x108   :  { %1534 = vmatprep.subr.bf16.mxu0 %v1533_v26 }
 0x109   :  { %1532 = vmatpush3.bf16.msra.mxu1 %v1529_v32  ;;  %1536 = vmatpush3.bf16.msra.mxu0 %v1533_v26  ;;  %v1048_v32 = vld [vmem:[%s2257_s9] sm:$0xff] }
 0x10a   :  { %584 = vrot.lane.b32.xlu0 %v526_v9, %s1678_s14  ;;  %1441 = vmatprep.subr.mxu1 %v85_v40  ;;  %v1547_v35 = vpack.c.bf16 %v1049_v36, %v1048_v32 }
 0x10b   :  { %538 = vrot.lane.b32.xlu1 %v311_v1, %s1681_s29  ;;  %1538 = vmatprep.subr.bf16.mxu0 %v1537_v50  ;;  %v88_v1 = vld [vmem:[%s2254_s6 + $0x8] sm:$0x3] }
 0x10c   :  { %v1541_v44 = vpack.c.bf16 %v88_v1, %v87_v37 }
 0x10d   :  { %1442 = vmatpush3.msra.mxu1 %v85_v40  ;;  %1540 = vmatpush3.bf16.msra.mxu0 %v1537_v50  ;;  %v1051_v40 = vld [vmem:[%s2257_s9 + $0x18] sm:$0xff]  ;;  %s1683_s9 = smov 36  }
 0x10e   :  { %1555 = vmatprep.subr.bf16.mxu1 %v1547_v35  ;;  %1543 = vmatprep.subr.msk.bf16.mxu0 %vm1758_vm2, %v1541_v44 }
 0x10f   :  { %536 = vrot.lane.b32.xlu1 %v304_v45, %s1681_s29  ;;  %v1551_v45 = vpack.c.bf16 %v1051_v40, %v1050_v38 }
 0x113   :  { %586 = vrot.lane.b32.xlu1 %v527_v16, %s1678_s14  ;;  %s1684_s14 = smov 40  }
 0x164   :  { %v583_v49 = vpop.permute.xlu0 %582  ;;  %v551_v51 = vpop.permute.xlu1 %550 }
 0x168   :  { %v567_v46 = vpop.permute.xlu1 %566  ;;  %v549_v52 = vpop.permute.xlu0 %548 }
 0x16c   :  { %v565_v0 = vpop.permute.xlu0 %564  ;;  %v555_v33 = vpop.permute.xlu1 %554 }
 0x170   :  { %v571_v39 = vpop.permute.xlu1 %570  ;;  %v581_v61 = vpop.permute.xlu0 %580 }
 0x174   :  { %v553_v42 = vpop.permute.xlu0 %552 }
 0x175   :  { %v535_v47 = vpop.permute.xlu1 %534 }
 0x176   :  { %v594_v58 = vsel %vm592_vm12, %v42_v59, %v535_v47 }
 0x177   :  { %v599_v34 = vsel %vm597_vm13, %v594_v58, %v551_v51 }
 0x178   :  { %v604_v9 = vsel %vm602_vm14, %v599_v34, %v567_v46  ;;  %v569_v16 = vpop.permute.xlu0 %568 }
 0x179   :  { %v533_v41 = vpop.permute.xlu1 %532  ;;  %v609_v53 = vsel %vm607_vm15, %v604_v9, %v583_v49  ;;  %v1288_v49 = vld [vmem:[%s2253_s5] ss:$0 sm:$0xff] }
 0x17a   :  { %v593_v4 = vsel %vm592_vm12, %v41_v63, %v533_v41 }
 0x17b   :  { %v598_v8 = vsel %vm597_vm13, %v593_v4, %v549_v52 }
 0x17c   :  { %v603_v12 = vsel %vm602_vm14, %v598_v8, %v565_v0  ;;  %v585_v62 = vpop.permute.xlu0 %584 }
 0x17d   :  { %v539_v13 = vpop.permute.xlu1 %538  ;;  %v608_v15 = vsel %vm607_vm15, %v603_v12, %v581_v61 }
 0x17e   :  { %1443 = vmatprep.mubr.msk.f32.mxu1 %vm618_vm0, %v608_v15  ;;  %v596_v22 = vsel %vm592_vm12, %v44_v11, %v539_v13 }
 0x17f   :  { %1444 = vmatmul.mubr.msk.f32.vlgmr.msra.gmra.mrb[12].mxu1 %vm618_vm0, %v609_v53  ;;  %v601_v29 = vsel %vm597_vm13, %v596_v22, %v555_v33 }
 0x180   :  { %v606_v19 = vsel %vm602_vm14, %v601_v29, %v571_v39  ;;  %1557 = vmatpush3.bf16.msra.mxu1 %v1547_v35 }
 0x181   :  { %v537_v28 = vpop.permute.xlu1 %536  ;;  %1556 = vmatprep.subr.bf16.mxu1 %v1551_v45 }
 0x182   :  { %v595_v17 = vsel %vm592_vm12, %v43_v23, %v537_v28 }
 0x183   :  { %v600_v55 = vsel %vm597_vm13, %v595_v17, %v553_v42 }
 0x184   :  { %v605_v14 = vsel %vm602_vm14, %v600_v55, %v569_v16  ;;  %1558 = vmatpush3.bf16.msra.mxu1 %v1551_v45 }
 0x185   :  { %v587_v18 = vpop.permute.xlu1 %586  ;;  %v610_v20 = vsel %vm607_vm15, %v605_v14, %v585_v62 }
 0x186   :  { %v611_v21 = vsel %vm607_vm15, %v606_v19, %v587_v18  ;;  %1446 = vmatprep.mubr.msk.f32.mxu1 %vm618_vm0, %v610_v20 }
 0x187   :  { %1447 = vmatmul.mubr.msk.f32.gmra.mrb[14].mxu1 %vm618_vm0, %v611_v21 }
 0x252   :  { %v1445_v51 = vpop.f32.mrb[12].mxu1 }
 0x253   :  { %v703_v46 = vadd.f32 %v1445_v51, %v1288_v49  ;;  %v697_v52 = vpop.f32.mrb[13].mxu1 }
 0x254   :  { %v698_v0 = vadd.f32 %v1288_v49, %v697_v52 }
 0x255   :  { %v1294_v33 = vmul.f32 -1.442695, %v703_v46 }
 0x256   :  { %v1293_v39 = vmul.f32 -1.442695, %v698_v0 }
 0x257   :  { %1602 = vpow2.f32 %v1294_v33 }
 0x258   :  { %1604 = vpow2.f32 %v1293_v39 }
 0x25a   :  { %v1448_v61 = vpop.f32.mrb[14].mxu1 }
 0x25b   :  { %v713_v59 = vadd.f32 %v1448_v61, %v1288_v49  ;;  %v707_v47 = vpop.f32.mrb[15].mxu1 }
 0x25c   :  { %v708_v58 = vadd.f32 %v1288_v49, %v707_v47 }
 0x25d   :  { %v1296_v63 = vmul.f32 -1.442695, %v713_v59 }
 0x25e   :  { %v1295_v42 = vmul.f32 -1.442695, %v708_v58 }
 0x25f   :  { %1606 = vpow2.f32 %v1296_v63 }
 0x260   :  { %1608 = vpow2.f32 %v1295_v42 }
 0x261   :  { %v1603_v34 = vpop.eup %1602 }
 0x262   :  { %v1605_v41 = vpop.eup %1604  ;;  %v729_v4 = vadd.f32 1.0, %v1603_v34 }
 0x263   :  { %v728_v9 = vadd.f32 1.0, %v1605_v41 }
 0x264   :  { %1610 = vrcp.f32 %v729_v4 }
 0x265   :  { %1612 = vrcp.f32 %v728_v9 }
 0x269   :  { %v1607_v8 = vpop.eup %1606 }
 0x26a   :  { %v1609_v11 = vpop.eup %1608  ;;  %v731_v12 = vadd.f32 1.0, %v1607_v8 }
 0x26b   :  { %v730_v13 = vadd.f32 1.0, %v1609_v11 }
 0x26c   :  { %1614 = vrcp.f32 %v731_v12 }
 0x26d   :  { %1616 = vrcp.f32 %v730_v13 }
 0x26e   :  { %v1611_v15 = vpop.eup %1610 }
 0x26f   :  { %v1613_v16 = vpop.eup %1612  ;;  %v2155_v22 = vmul.f32 %v1611_v15, %v703_v46 }
 0x270   :  { %v2153_v53 = vmul.f32 %v1613_v16, %v698_v0 }
 0x272   :  { %1457 = vmatprep.mubr.msk.f32.mxu0 %vm750_vm1, %v2153_v53 }
 0x273   :  { %1458 = vmatmul.mubr.msk.f32.vlgmr.msra.gmra.mrb[0].mxu0 %vm750_vm1, %v2155_v22 }
 0x274   :  { %1546 = vmatpush3.bf16.msk.msra.mxu0 %vm1758_vm2, %v1541_v44  ;;  %vm1244_vm2 = vcmask 293888  }
 0x275   :  { %1548 = vmatprep.subr.bf16.mxu0 %v1547_v35 }
 0x276   :  { %v1615_v23 = vpop.eup %1614 }
 0x277   :  { %v1617_v28 = vpop.eup %1616  ;;  %v2165_v17 = vmul.f32 %v1615_v23, %v713_v59 }
 0x278   :  { %v2163_v29 = vmul.f32 %v1617_v28, %v708_v58 }
 0x27a   :  { %1460 = vmatprep.mubr.msk.f32.mxu0 %vm750_vm1, %v2163_v29  ;;  %1496 = vmatprep.mubr.msk.f32.mxu1 %vm750_vm1, %v2163_v29 }
 0x27b   :  { %1461 = vmatmul.mubr.msk.f32.gmra.mrb[2].mxu0 %vm750_vm1, %v2165_v17  ;;  %1497 = vmatmul.mubr.msk.f32.vlgmr.msra.gmra.mrb[16].mxu1 %vm750_vm1, %v2165_v17 }
 0x27c   :  { %1467 = vmatprep.mubr.msk.f32.mxu0 %vm94_vm3, %v1900_v3 }
 0x27f   :  { %1468 = vmatmul.mubr.msk.f32.vlgmr.msra.gmra.mrb[4].mxu0 %vm94_vm3, %v1898_v2 }
 0x280   :  { %1550 = vmatpush3.bf16.msra.mxu0 %v1547_v35  ;;  %1470 = vmatprep.mubr.msk.f32.mxu0 %vm94_vm3, %v1908_v10 }
 0x281   :  { %1552 = vmatprep.subr.bf16.mxu0 %v1551_v45 }
 0x283   :  { %1471 = vmatmul.mubr.msk.f32.gmra.mrb[6].mxu0 %vm94_vm3, %v1904_v7 }
 0x284   :  { %1473 = vmatprep.mubr.msk.f32.mxu0 %vm94_vm3, %v1936_v30  ;;  %1554 = vmatpush3.bf16.msra.mxu0 %v1551_v45 }
 0x287   :  { %1474 = vmatmul.mubr.msk.f32.gmra.mrb[8].mxu0 %vm94_vm3, %v1929_v24 }
 0x288   :  { %1476 = vmatprep.mubr.msk.f32.mxu0 %vm94_vm3, %v1952_v6 }
 0x28b   :  { %1477 = vmatmul.mubr.msk.f32.gmra.mrb[10].mxu0 %vm94_vm3, %v1948_v56  ;;  %v2206_v56 = vld [vmem:[#allocation2] ss:$0 sm:$0xff] }
 0x28c   :  { %1479 = vmatprep.mubr.msk.f32.mxu0 %vm94_vm3, %v1970_v48 }
 0x28f   :  { %1480 = vmatmul.mubr.msk.f32.gmra.mrb[12].mxu0 %vm94_vm3, %v1966_v60 }
 0x290   :  { %1482 = vmatprep.mubr.msk.f32.mxu0 %vm94_vm3, %v1994_v54 }
 0x293   :  { %1483 = vmatmul.mubr.msk.f32.gmra.mrb[14].mxu0 %vm94_vm3, %v1986_v31  ;;  %vm1249_vm3 = vcmask 326656  }
 0x294   :  { %1493 = vmatprep.mubr.msk.f32.mxu0 %vm750_vm1, %v2153_v53 }
 0x297   :  { %1494 = vmatmul.mubr.msk.f32.vlgmr.msra.gmra.mrb[16].mxu0 %vm750_vm1, %v2155_v22 }
 0x346   :  { %v1459_v2 = vpop.f32.mrb[0].mxu0 }
 0x347   :  { %v835_v3 = vadd.f32 %v1459_v2, %v1297_v5  ;;  %v829_v7 = vpop.f32.mrb[1].mxu0 }
 0x348   :  { %v830_v10 = vadd.f32 %v1297_v5, %v829_v7 }
 0x349   :  { %v1303_v24 = vmul.f32 -1.442695, %v835_v3 }
 0x34a   :  { %v1302_v30 = vmul.f32 -1.442695, %v830_v10 }
 0x34b   :  { %1618 = vpow2.f32 %v1303_v24 }
 0x34c   :  { %1620 = vpow2.f32 %v1302_v30 }
 0x34e   :  { %v1462_v6 = vpop.f32.mrb[2].mxu0  ;;  %v1498_v60 = vpop.f32.mrb[16].mxu1 }
 0x34f   :  { %v845_v48 = vadd.f32 %v1462_v6, %v1297_v5  ;;  %v1141_v31 = vadd.f32 %v1498_v60, %v2206_v56  ;;  %v839_v54 = vpop.f32.mrb[3].mxu0  ;;  %v1135_v55 = vpop.f32.mrb[17].mxu1 }
 0x350   :  { %v840_v62 = vadd.f32 %v1297_v5, %v839_v54  ;;  %v1136_v14 = vadd.f32 %v2206_v56, %v1135_v55 }
 0x351   :  { %v1305_v18 = vmul.f32 -1.442695, %v845_v48  ;;  %v1327_v19 = vmul.f32 -1.442695, %v1141_v31 }
 0x352   :  { %v1304_v20 = vmul.f32 -1.442695, %v840_v62  ;;  %v1326_v21 = vmul.f32 -1.442695, %v1136_v14  ;;  %v1469_v25 = vpop.f32.mrb[4].mxu0 }
 0x353   :  { %1622 = vpow2.f32 %v1305_v18  ;;  %v977_v57 = vpop.f32.mrb[5].mxu0 }
 0x354   :  { %1624 = vpow2.f32 %v1327_v19 }
 0x355   :  { %v1619_v26 = vpop.eup %1618  ;;  %1626 = vpow2.f32 %v1304_v20 }
 0x356   :  { %v1621_v27 = vpop.eup %1620  ;;  %v861_v43 = vadd.f32 1.0, %v1619_v26  ;;  %1628 = vpow2.f32 %v1326_v21  ;;  %v1472_v50 = vpop.f32.mrb[6].mxu0 }
 0x357   :  { %v860_v32 = vadd.f32 1.0, %v1621_v27  ;;  %v987_v36 = vpop.f32.mrb[7].mxu0 }
 0x358   :  { %1630 = vrcp.f32 %v861_v43 }
 0x359   :  { %1632 = vrcp.f32 %v860_v32 }
 0x35a   :  { %v1475_v37 = vpop.f32.mrb[8].mxu0 }
 0x35b   :  { %v997_v35 = vpop.f32.mrb[9].mxu0 }
 0x35d   :  { %v1623_v1 = vpop.eup %1622 }
 0x35e   :  { %v1625_v38 = vpop.eup %1624  ;;  %v863_v40 = vadd.f32 1.0, %v1623_v1  ;;  %v1478_v44 = vpop.f32.mrb[10].mxu0 }
 0x35f   :  { %v1627_v45 = vpop.eup %1626  ;;  %v1159_v49 = vadd.f32 1.0, %v1625_v38  ;;  %v1007_v51 = vpop.f32.mrb[11].mxu0 }
 0x360   :  { %v1629_v46 = vpop.eup %1628  ;;  %1634 = vrcp.f32 %v863_v40  ;;  %v862_v52 = vadd.f32 1.0, %v1627_v45 }
 0x361   :  { %1636 = vrcp.f32 %v1159_v49  ;;  %v1158_v0 = vadd.f32 1.0, %v1629_v46 }
 0x362   :  { %v1631_v33 = vpop.eup %1630  ;;  %1638 = vrcp.f32 %v862_v52  ;;  %v1481_v39 = vpop.f32.mrb[12].mxu0 }
 0x363   :  { %v1633_v61 = vpop.eup %1632  ;;  %1640 = vrcp.f32 %v1158_v0  ;;  %v1037_v59 = vmul.f32 %v1631_v33, %v1469_v25  ;;  %v1041_v47 = vmul.f32 %v1631_v33, %v1475_v37  ;;  %v1045_v58 = vmul.f32 %v1631_v33, %v1481_v39  ;;  %v1017_v63 = vpop.f32.mrb[13].mxu0 }
 0x364   :  { %v1036_v42 = vmul.f32 %v1633_v61, %v977_v57  ;;  %v1040_v34 = vmul.f32 %v1633_v61, %v997_v35  ;;  %v1044_v41 = vmul.f32 %v1633_v61, %v1017_v63 }
 0x365   :  { %1198 = vrot.lane.b32.xlu0 %v1037_v59, %s1682_s8 }
 0x366   :  { %v1484_v4 = vpop.f32.mrb[14].mxu0  ;;  %1196 = vrot.lane.b32.xlu1 %v1036_v42, %s1682_s8 }
 0x367   :  { %v1027_v9 = vpop.f32.mrb[15].mxu0 }
 0x369   :  { %1214 = vrot.lane.b32.xlu0 %v1041_v47, %s1683_s9 }
 0x36a   :  { %v1635_v8 = vpop.eup %1634  ;;  %v1495_v11 = vpop.f32.mrb[16].mxu0  ;;  %1212 = vrot.lane.b32.xlu1 %v1040_v34, %s1683_s9 }
 0x36b   :  { %v1637_v12 = vpop.eup %1636  ;;  %v1039_v13 = vmul.f32 %v1635_v8, %v1472_v50  ;;  %v1043_v15 = vmul.f32 %v1635_v8, %v1478_v44  ;;  %v1047_v16 = vmul.f32 %v1635_v8, %v1484_v4  ;;  %v1131_v23 = vadd.f32 %v1495_v11, %v2206_v56  ;;  %v1125_v28 = vpop.f32.mrb[17].mxu0 }
 0x36c   :  { %v1639_v5 = vpop.eup %1638  ;;  %v1126_v2 = vadd.f32 %v2206_v56, %v1125_v28 }
 0x36d   :  { %v1641_v3 = vpop.eup %1640  ;;  %v1038_v7 = vmul.f32 %v1639_v5, %v987_v36  ;;  %v1042_v10 = vmul.f32 %v1639_v5, %v1007_v51  ;;  %v1046_v24 = vmul.f32 %v1639_v5, %v1027_v9  ;;  %v1325_v30 = vmul.f32 -1.442695, %v1131_v23  ;;  %1185 = vperm.xlu0 %1592, %v1637_v12  }
 0x36e   :  { %v1324_v6 = vmul.f32 -1.442695, %v1126_v2  ;;  %1180 = vperm.xlu1 %1593, %v1641_v3  }
 0x36f   :  { %1642 = vpow2.f32 %v1325_v30 }
 0x370   :  { %1644 = vpow2.f32 %v1324_v6 }
 0x371   :  { %1202 = vrot.lane.b32.xlu0 %v1039_v13, %s1682_s8 }
 0x372   :  { %1200 = vrot.lane.b32.xlu1 %v1038_v7, %s1682_s8 }
 0x375   :  { %1218 = vrot.lane.b32.xlu0 %v1043_v15, %s1683_s9 }
 0x379   :  { %v1643_v60 = vpop.eup %1642 }
 0x37a   :  { %v1645_v48 = vpop.eup %1644  ;;  %v1157_v31 = vadd.f32 1.0, %v1643_v60 }
 0x37b   :  { %v1156_v54 = vadd.f32 1.0, %v1645_v48 }
 0x37c   :  { %1646 = vrcp.f32 %v1157_v31 }
 0x37d   :  { %1648 = vrcp.f32 %v1156_v54 }
 0x386   :  { %v1647_v56 = vpop.eup %1646 }
 0x387   :  { %v1649_v55 = vpop.eup %1648  ;;  %1175 = vperm.xlu1 %1593, %v1647_v56  }
 0x388   :  { %1170 = vperm.xlu0 %1592, %v1649_v55  }
 0x38b   :  { %1216 = vrot.lane.b32.xlu1 %v1042_v10, %s1683_s9 }
 0x38c   :  { %1230 = vrot.lane.b32.xlu0 %v1045_v58, %s1684_s14 }
 0x38f   :  { %1228 = vrot.lane.b32.xlu1 %v1044_v41, %s1684_s14 }
 0x390   :  { %1234 = vrot.lane.b32.xlu0 %v1047_v16, %s1684_s14 }
 0x393   :  { %1232 = vrot.lane.b32.xlu1 %v1046_v24, %s1684_s14 }
 0x3d7   :  { %v1199_v62 = vpop.permute.xlu0 %1198 }
 0x3d8   :  { %v1197_v14 = vpop.permute.xlu1 %1196 }
 0x3db   :  { %v1215_v18 = vpop.permute.xlu0 %1214 }
 0x3dc   :  { %v1213_v20 = vpop.permute.xlu1 %1212 }
 0x3ec   :  { %v1186_v19 = vpop.permute.xlu0 %1185 }
 0x3ed   :  { %v1181_v21 = vpop.permute.xlu1 %1180  ;;  %v1191_v40 = vmul.f32 %v1186_v19, %v2165_v17 }
 0x3ee   :  { %v1190_v49 = vmul.f32 %v1181_v21, %v2163_v29 }
 0x3f0   :  { %v1203_v25 = vpop.permute.xlu0 %1202 }
 0x3f1   :  { %v1201_v57 = vpop.permute.xlu1 %1200 }
 0x3f2   :  { %v1242_v0 = vsel %vm750_vm1, %v1190_v49, %v1201_v57 }
 0x3f4   :  { %v1219_v26 = vpop.permute.xlu0 %1218 }
 0x406   :  { %v1176_v27 = vpop.permute.xlu1 %1175 }
 0x407   :  { %v1189_v43 = vmul.f32 %v1176_v27, %v2155_v22  ;;  %v1171_v50 = vpop.permute.xlu0 %1170  ;;  %v1243_v22 = vsel %vm750_vm1, %v1191_v40, %v1203_v25 }
 0x408   :  { %v1188_v32 = vmul.f32 %v1171_v50, %v2153_v53  ;;  %v1248_v51 = vsel %vm1244_vm2, %v1243_v22, %v1219_v26 }
 0x409   :  { %v1241_v36 = vsel %vm750_vm1, %v1189_v43, %v1199_v62 }
 0x40a   :  { %v1217_v37 = vpop.permute.xlu1 %1216  ;;  %v1246_v35 = vsel %vm1244_vm2, %v1241_v36, %v1215_v18  ;;  %v1240_v1 = vsel %vm750_vm1, %v1188_v32, %v1197_v14 }
 0x40b   :  { %v1231_v38 = vpop.permute.xlu0 %1230  ;;  %v1245_v53 = vsel %vm1244_vm2, %v1240_v1, %v1213_v20  ;;  %v1247_v33 = vsel %vm1244_vm2, %v1242_v0, %v1217_v37 }
 0x40c   :  { %v1251_v44 = vsel %vm1249_vm3, %v1246_v35, %v1231_v38 }
 0x40d   :  { %1256 = vst.msk [vmem:[#allocation3 + $0x8] sm:$0xff] %vm1254_vm4, %v1251_v44 }
 0x40e   :  { %v1229_v45 = vpop.permute.xlu1 %1228 }
 0x40f   :  { %v1250_v46 = vsel %vm1249_vm3, %v1245_v53, %v1229_v45  ;;  %v1235_v52 = vpop.permute.xlu0 %1234 }
 0x410   :  { %1255 = vst.msk [vmem:[#allocation3] sm:$0xff] %vm1254_vm4, %v1250_v46  ;;  %v1253_v17 = vsel %vm1249_vm3, %v1248_v51, %v1235_v52 }
 0x411   :  { %1258 = vst.msk [vmem:[#allocation3 + $0x18] sm:$0xff] %vm1254_vm4, %v1253_v17 }
 0x412   :  { %v1233_v39 = vpop.permute.xlu1 %1232 }
 0x413   :  { %v1252_v29 = vsel %vm1249_vm3, %v1247_v33, %v1233_v39 }
 0x414   :  { %1257 = vst.msk [vmem:[#allocation3 + $0x10] sm:$0xff] %vm1254_vm4, %v1252_v29 }
 0x415   :  { %1661 = shalt.err (!%p1658_p4)
}
 0x416   :  { %s1662_s23 = scalar_lea.hbm %s2259_s11, 512 }
 0x417   :  { %p1663_p5 = scmp.ne.s32.totalorder %s2259_s11, %s1662_s23  ;;  %p1666_p6 = scmp.lt.u32.totalorder %s1662_s23, %s2259_s11 }
 0x419   :  { %p1668_p7 = pnand %p1666_p6, %p1663_p5 }
 0x41b   :  { %1671 = shalt.err (!%p1668_p7)
}
 0x41c   :  { %s1686_s26 = smov 128   ;;  %s1687_s27 = smov 8  }
 0x41d   :  { %1270 = dma.vmem_to_hbm [thread:$0]  %s1265_s21, 512, %s2259_s11, [#allocation4], %s1686_s26, %s1686_s26, %s1687_s27  }
 0x41e   :  { %1672 = dma.done.wait [#allocation4], 512  }
 0x41f   :  { %1673 = vsyncadd [#allocation4], 4294966784 }
 0x420   :  { %1274 = vsyncpa [#allocation4], 1 }

</bundles_post_ra>
